<compile_context>
chip_gen: v7x
topology: tpu7x:2x2x1
jax: 0.10.0
libtpu: 0.0.40
codegen_flags: <defaults>
</compile_context>

<pallas_src>
import jax
import jax.numpy as jnp
import numpy as np
from jax.experimental import pallas as pl
from jax.experimental.pallas import tpu as pltpu


def _decoder_kernel(tok_ref, emb_hbm, h0_ref, c0_ref, wcat_ref, b_ref,
                    wout_ref, bout_ref,
                    logits_ref, hout_ref, cout_ref,
                    x_buf, sem):
    """Entire DecoderRNN step (embedding -> L LSTM layers -> output proj)."""
    B, H = x_buf.shape
    O = emb_hbm.shape[0]
    L = h0_ref.shape[0]

    # ---- Embedding lookup: gather B rows HBM -> VMEM via per-row DMA. -----
    # No full-table VMEM load and no one-hot matmul; cost is O(B*H) bytes.
    copies = []
    for b in range(B):
        t = tok_ref[b]                                   # scalar from SMEM
        t = jnp.minimum(jnp.maximum(t, 0), O - 1)        # guard OOB token ids
        cp = pltpu.make_async_copy(emb_hbm.at[pl.ds(t, 1), :],
                                   x_buf.at[pl.ds(b, 1), :],
                                   sem.at[b])
        cp.start()
        copies.append(cp)
    for cp in copies:
        cp.wait()

    x = x_buf[...]                                       # [B, H] f32
    # Eval-mode dropout on the embedding: identity.

    # ---- L stacked LSTM layers (static unroll, sequential carry). ---------
    for layer in range(L):
        h_prev = h0_ref[layer]                           # [B, H] f32
        c_prev = c0_ref[layer]                           # [B, H] f32

        # Fused gate matmul: [B, 2H] @ [2H, 4H] -> [B, 4H]  (K=256 MXU width)
        xh = jnp.concatenate([x, h_prev], axis=-1).astype(wcat_ref.dtype)
        gates = (jnp.dot(xh, wcat_ref[layer],
                         preferred_element_type=jnp.float32)
                 + b_ref[layer])                         # [B, 4H] f32

        i = jax.nn.sigmoid(gates[:, 0 * H:1 * H])
        f = jax.nn.sigmoid(gates[:, 1 * H:2 * H])
        g = jnp.tanh(gates[:, 2 * H:3 * H])
        o = jax.nn.sigmoid(gates[:, 3 * H:4 * H])

        c_new = f * c_prev + i * g
        h_new = o * jnp.tanh(c_new)

        hout_ref[layer] = h_new
        cout_ref[layer] = c_new
        x = h_new       # eval-mode inter-layer dropout: identity

    # ---- Output projection on the last layer's hidden state. --------------
    logits_ref[...] = (
        jnp.dot(x.astype(wout_ref.dtype), wout_ref[...],
                preferred_element_type=jnp.float32)
        + bout_ref[...]
    ).astype(logits_ref.dtype)


@jax.jit
def decoder_rnn_step(input_tokens, last_hidden, params):
    """Single-step DecoderRNN forward.

    input_tokens: [B] int32
    last_hidden: (h, c), each [L, B, H] float32
    returns: (logits [B, O], (h_new [L, B, H], c_new [L, B, H]))
    """
    h0, c0 = last_hidden
    L, B, H = h0.shape
    O = params["w_out"].shape[1]

    tokens = input_tokens.astype(jnp.int32).reshape(B)

    out_shape = (
        jax.ShapeDtypeStruct((B, O), jnp.float32),     # logits
        jax.ShapeDtypeStruct((L, B, H), jnp.float32),  # h_out (aliases h0)
        jax.ShapeDtypeStruct((L, B, H), jnp.float32),  # c_out (aliases c0)
    )

    vmem = pltpu.MemorySpace.VMEM
    smem = pltpu.MemorySpace.SMEM

    logits, h_out, c_out = pl.pallas_call(
        _decoder_kernel,
        out_shape=out_shape,
        in_specs=[
            pl.BlockSpec(memory_space=smem),     # tokens [B] int32 (SMEM)
            pl.BlockSpec(memory_space=pl.ANY),   # embedding [O, H] stays in HBM
            pl.BlockSpec(memory_space=vmem),     # h0   [L, B, H] f32
            pl.BlockSpec(memory_space=vmem),     # c0   [L, B, H] f32
            pl.BlockSpec(memory_space=vmem),     # W_cat [L, 2H, 4H] bf16
            pl.BlockSpec(memory_space=vmem),     # b    [L, 1, 4H] f32
            pl.BlockSpec(memory_space=vmem),     # W_out [H, O] bf16
            pl.BlockSpec(memory_space=vmem),     # b_out [1, O] f32
        ],
        out_specs=[
            pl.BlockSpec(memory_space=vmem),     # logits
            pl.BlockSpec(memory_space=vmem),     # h_out
            pl.BlockSpec(memory_space=vmem),     # c_out
        ],
        scratch_shapes=[
            pltpu.VMEM((B, H), jnp.float32),     # gathered embeddings
            pltpu.SemaphoreType.DMA((B,)),       # per-row gather sems
        ],
        input_output_aliases={2: 1, 3: 2},       # h0 -> h_out, c0 -> c_out
        compiler_params=pltpu.CompilerParams(
            vmem_limit_bytes=32 * 1024 * 1024),
    )(tokens, params["embedding"], h0, c0,
      params["w_cat"], params["b"], params["w_out"], params["b_out"])

    return logits, (h_out, c_out)


def _reference(input_tokens, last_hidden, params):
    """Pure-JAX reference mirroring the kernel's numerics (bf16 LSTM/out weights)."""
    h0, c0 = last_hidden
    L, B, H = h0.shape
    x = jnp.take(params["embedding"], input_tokens, axis=0).astype(jnp.float32)
    h_list, c_list = [], []
    for l in range(L):
        xh = jnp.concatenate([x, h0[l]], axis=-1).astype(params["w_cat"].dtype)
        gates = (jnp.dot(xh, params["w_cat"][l],
                         preferred_element_type=jnp.float32)
                 + params["b"][l])
        i = jax.nn.sigmoid(gates[:, 0 * H:1 * H])
        f = jax.nn.sigmoid(gates[:, 1 * H:2 * H])
        g = jnp.tanh(gates[:, 2 * H:3 * H])
        o = jax.nn.sigmoid(gates[:, 3 * H:4 * H])
        c_new = f * c0[l] + i * g
        h_new = o * jnp.tanh(c_new)
        h_list.append(h_new)
        c_list.append(c_new)
        x = h_new
    logits = (jnp.dot(x.astype(params["w_out"].dtype), params["w_out"],
                      preferred_element_type=jnp.float32)
              + params["b_out"])
    return logits, (jnp.stack(h_list), jnp.stack(c_list))


def init_params(key, hidden_size, output_size, num_layers):
    """Deterministic synthetic parameters (PyTorch shapes, pre-transposed &
    pre-fused; matmul weights in bf16, embedding/biases in f32)."""
    keys = jax.random.split(key, 8)
    s = 1.0 / np.sqrt(hidden_size)
    emb = jax.random.normal(keys[0], (output_size, hidden_size), jnp.float32)
    w_ih = jax.random.uniform(keys[1], (num_layers, hidden_size, 4 * hidden_size),
                              jnp.float32, -s, s)
    w_hh = jax.random.uniform(keys[2], (num_layers, hidden_size, 4 * hidden_size),
                              jnp.float32, -s, s)
    b_ih = jax.random.uniform(keys[3], (num_layers, 1, 4 * hidden_size),
                              jnp.float32, -s, s)
    b_hh = jax.random.uniform(keys[4], (num_layers, 1, 4 * hidden_size),
                              jnp.float32, -s, s)
    w_out = jax.random.uniform(keys[5], (hidden_size, output_size),
                               jnp.float32, -s, s)
    b_out = jax.random.uniform(keys[6], (1, output_size), jnp.float32, -s, s)
    # Fuse W_ih / W_hh along the contraction (input) axis: [L, 2H, 4H].
    w_cat = jnp.concatenate([w_ih, w_hh], axis=1)
    # TODO(synk): keep an f32-weight path for exact parity checks against a
    # true f32 PyTorch DecoderRNN; bf16 weights diverge slightly at large H/L.
    return {
        "embedding": emb,                        # f32 (gathered, not matmul'd)
        "w_cat": w_cat.astype(jnp.bfloat16),
        "b": b_ih + b_hh,                        # PyTorch LSTM adds both biases
        "w_out": w_out.astype(jnp.bfloat16),
        "b_out": b_out,
    }


if __name__ == "__main__":
    B = 8            # batch
    H = 128          # hidden_size
    O = 256          # output_size (vocab)
    L = 2            # num_layers

    key = jax.random.PRNGKey(0)
    kp, kt, km = jax.random.split(key, 3)
    params = init_params(kp, H, O, L)

    input_tokens = jax.random.randint(kt, (B,), 0, O, dtype=jnp.int32)

    # init_hidden: broadcast an encoder message to all layers (h and c alike).
    encoder_message = jax.random.normal(km, (B, H), jnp.float32)
    h0 = jnp.broadcast_to(encoder_message[None], (L, B, H)).copy()
    c0 = jnp.broadcast_to(encoder_message[None], (L, B, H)).copy()

    # Compute the pure-JAX reference first (h0/c0 may be aliased/donated by
    # the kernel's in-place state update).
    ref_logits, (ref_h, ref_c) = _reference(input_tokens, (h0, c0), params)

    logits, (h_new, c_new) = decoder_rnn_step(input_tokens, (h0, c0), params)
    jax.block_until_ready((logits, h_new, c_new))

    np.testing.assert_allclose(np.asarray(logits), np.asarray(ref_logits),
                               rtol=1e-4, atol=1e-4)
    np.testing.assert_allclose(np.asarray(h_new), np.asarray(ref_h),
                               rtol=1e-4, atol=1e-4)
    np.testing.assert_allclose(np.asarray(c_new), np.asarray(ref_c),
                               rtol=1e-4, atol=1e-4)

    print("KERNEL_OK")
</pallas_src>

<mosaic_0001>
module attributes {stable_mosaic.version = 11 : i64} {
  func.func @_decoder_kernel(%arg0: memref<8xi32, #tpu.memory_space<smem>>, %arg1: memref<256x128xf32, #tpu.memory_space<any>>, %arg2: memref<2x8x128xf32, #tpu.memory_space<vmem>>, %arg3: memref<2x8x128xf32, #tpu.memory_space<vmem>>, %arg4: memref<2x256x512xbf16, #tpu.memory_space<vmem>>, %arg5: memref<2x1x512xf32, #tpu.memory_space<vmem>>, %arg6: memref<128x256xbf16, #tpu.memory_space<vmem>>, %arg7: memref<1x256xf32, #tpu.memory_space<vmem>>, %arg8: memref<8x256xf32, #tpu.memory_space<vmem>>, %arg9: memref<2x8x128xf32, #tpu.memory_space<vmem>>, %arg10: memref<2x8x128xf32, #tpu.memory_space<vmem>>, %arg11: memref<8x128xf32, #tpu.memory_space<vmem>>, %arg12: memref<8x!tpu.dma_semaphore, #tpu.memory_space<semaphore_mem>>) attributes {dimension_semantics = [], scalar_prefetch = 0 : i64, scratch_operands = 2 : i64, tpu.core_type = #tpu.core_type<tc>} {
    %c0 = arith.constant 0 : index
    %0 = memref.load %arg0[%c0] : memref<8xi32, #tpu.memory_space<smem>>
    %c0_i32 = arith.constant 0 : i32
    %1 = arith.maxsi %0, %c0_i32 : i32
    %c255_i32 = arith.constant 255 : i32
    %2 = arith.minsi %1, %c255_i32 : i32
    %c0_i32_0 = arith.constant 0 : i32
    %c0_i32_1 = arith.constant 0 : i32
    %3 = tpu.memref_slice %arg1[%2, %c0_i32_1] : memref<256x128xf32, #tpu.memory_space<any>> -> memref<1x128xf32, #tpu.memory_space<any>>
    %c0_i32_2 = arith.constant 0 : i32
    %c0_i32_3 = arith.constant 0 : i32
    %4 = tpu.memref_slice %arg11[%c0_i32_2, %c0_i32_3] : memref<8x128xf32, #tpu.memory_space<vmem>> -> memref<1x128xf32, #tpu.memory_space<vmem>>
    %5 = tpu.memref_slice %arg12[%c0_i32_0] : memref<8x!tpu.dma_semaphore, #tpu.memory_space<semaphore_mem>> -> memref<1x!tpu.dma_semaphore, #tpu.memory_space<semaphore_mem>>
    %6 = tpu.memref_squeeze %5 : memref<1x!tpu.dma_semaphore, #tpu.memory_space<semaphore_mem>> -> memref<!tpu.dma_semaphore, #tpu.memory_space<semaphore_mem>>
    tpu.enqueue_dma source(%3 : memref<1x128xf32, #tpu.memory_space<any>>) target(%4 : memref<1x128xf32, #tpu.memory_space<vmem>>) target_semaphore(%6 : memref<!tpu.dma_semaphore, #tpu.memory_space<semaphore_mem>>)
    %c1 = arith.constant 1 : index
    %7 = memref.load %arg0[%c1] : memref<8xi32, #tpu.memory_space<smem>>
    %c0_i32_4 = arith.constant 0 : i32
    %8 = arith.maxsi %7, %c0_i32_4 : i32
    %c255_i32_5 = arith.constant 255 : i32
    %9 = arith.minsi %8, %c255_i32_5 : i32
    %c1_i32 = arith.constant 1 : i32
    %c0_i32_6 = arith.constant 0 : i32
    %10 = tpu.memref_slice %arg1[%9, %c0_i32_6] : memref<256x128xf32, #tpu.memory_space<any>> -> memref<1x128xf32, #tpu.memory_space<any>>
    %c1_i32_7 = arith.constant 1 : i32
    %c0_i32_8 = arith.constant 0 : i32
    %11 = tpu.memref_slice %arg11[%c1_i32_7, %c0_i32_8] : memref<8x128xf32, #tpu.memory_space<vmem>> -> memref<1x128xf32, #tpu.memory_space<vmem>>
    %12 = tpu.memref_slice %arg12[%c1_i32] : memref<8x!tpu.dma_semaphore, #tpu.memory_space<semaphore_mem>> -> memref<1x!tpu.dma_semaphore, #tpu.memory_space<semaphore_mem>>
    %13 = tpu.memref_squeeze %12 : memref<1x!tpu.dma_semaphore, #tpu.memory_space<semaphore_mem>> -> memref<!tpu.dma_semaphore, #tpu.memory_space<semaphore_mem>>
    tpu.enqueue_dma source(%10 : memref<1x128xf32, #tpu.memory_space<any>>) target(%11 : memref<1x128xf32, #tpu.memory_space<vmem>>) target_semaphore(%13 : memref<!tpu.dma_semaphore, #tpu.memory_space<semaphore_mem>>)
    %c2 = arith.constant 2 : index
    %14 = memref.load %arg0[%c2] : memref<8xi32, #tpu.memory_space<smem>>
    %c0_i32_9 = arith.constant 0 : i32
    %15 = arith.maxsi %14, %c0_i32_9 : i32
    %c255_i32_10 = arith.constant 255 : i32
    %16 = arith.minsi %15, %c255_i32_10 : i32
    %c2_i32 = arith.constant 2 : i32
    %c0_i32_11 = arith.constant 0 : i32
    %17 = tpu.memref_slice %arg1[%16, %c0_i32_11] : memref<256x128xf32, #tpu.memory_space<any>> -> memref<1x128xf32, #tpu.memory_space<any>>
    %c2_i32_12 = arith.constant 2 : i32
    %c0_i32_13 = arith.constant 0 : i32
    %18 = tpu.memref_slice %arg11[%c2_i32_12, %c0_i32_13] : memref<8x128xf32, #tpu.memory_space<vmem>> -> memref<1x128xf32, #tpu.memory_space<vmem>>
    %19 = tpu.memref_slice %arg12[%c2_i32] : memref<8x!tpu.dma_semaphore, #tpu.memory_space<semaphore_mem>> -> memref<1x!tpu.dma_semaphore, #tpu.memory_space<semaphore_mem>>
    %20 = tpu.memref_squeeze %19 : memref<1x!tpu.dma_semaphore, #tpu.memory_space<semaphore_mem>> -> memref<!tpu.dma_semaphore, #tpu.memory_space<semaphore_mem>>
    tpu.enqueue_dma source(%17 : memref<1x128xf32, #tpu.memory_space<any>>) target(%18 : memref<1x128xf32, #tpu.memory_space<vmem>>) target_semaphore(%20 : memref<!tpu.dma_semaphore, #tpu.memory_space<semaphore_mem>>)
    %c3 = arith.constant 3 : index
    %21 = memref.load %arg0[%c3] : memref<8xi32, #tpu.memory_space<smem>>
    %c0_i32_14 = arith.constant 0 : i32
    %22 = arith.maxsi %21, %c0_i32_14 : i32
    %c255_i32_15 = arith.constant 255 : i32
    %23 = arith.minsi %22, %c255_i32_15 : i32
    %c3_i32 = arith.constant 3 : i32
    %c0_i32_16 = arith.constant 0 : i32
    %24 = tpu.memref_slice %arg1[%23, %c0_i32_16] : memref<256x128xf32, #tpu.memory_space<any>> -> memref<1x128xf32, #tpu.memory_space<any>>
    %c3_i32_17 = arith.constant 3 : i32
    %c0_i32_18 = arith.constant 0 : i32
    %25 = tpu.memref_slice %arg11[%c3_i32_17, %c0_i32_18] : memref<8x128xf32, #tpu.memory_space<vmem>> -> memref<1x128xf32, #tpu.memory_space<vmem>>
    %26 = tpu.memref_slice %arg12[%c3_i32] : memref<8x!tpu.dma_semaphore, #tpu.memory_space<semaphore_mem>> -> memref<1x!tpu.dma_semaphore, #tpu.memory_space<semaphore_mem>>
    %27 = tpu.memref_squeeze %26 : memref<1x!tpu.dma_semaphore, #tpu.memory_space<semaphore_mem>> -> memref<!tpu.dma_semaphore, #tpu.memory_space<semaphore_mem>>
    tpu.enqueue_dma source(%24 : memref<1x128xf32, #tpu.memory_space<any>>) target(%25 : memref<1x128xf32, #tpu.memory_space<vmem>>) target_semaphore(%27 : memref<!tpu.dma_semaphore, #tpu.memory_space<semaphore_mem>>)
    %c4 = arith.constant 4 : index
    %28 = memref.load %arg0[%c4] : memref<8xi32, #tpu.memory_space<smem>>
    %c0_i32_19 = arith.constant 0 : i32
    %29 = arith.maxsi %28, %c0_i32_19 : i32
    %c255_i32_20 = arith.constant 255 : i32
    %30 = arith.minsi %29, %c255_i32_20 : i32
    %c4_i32 = arith.constant 4 : i32
    %c0_i32_21 = arith.constant 0 : i32
    %31 = tpu.memref_slice %arg1[%30, %c0_i32_21] : memref<256x128xf32, #tpu.memory_space<any>> -> memref<1x128xf32, #tpu.memory_space<any>>
    %c4_i32_22 = arith.constant 4 : i32
    %c0_i32_23 = arith.constant 0 : i32
    %32 = tpu.memref_slice %arg11[%c4_i32_22, %c0_i32_23] : memref<8x128xf32, #tpu.memory_space<vmem>> -> memref<1x128xf32, #tpu.memory_space<vmem>>
    %33 = tpu.memref_slice %arg12[%c4_i32] : memref<8x!tpu.dma_semaphore, #tpu.memory_space<semaphore_mem>> -> memref<1x!tpu.dma_semaphore, #tpu.memory_space<semaphore_mem>>
    %34 = tpu.memref_squeeze %33 : memref<1x!tpu.dma_semaphore, #tpu.memory_space<semaphore_mem>> -> memref<!tpu.dma_semaphore, #tpu.memory_space<semaphore_mem>>
    tpu.enqueue_dma source(%31 : memref<1x128xf32, #tpu.memory_space<any>>) target(%32 : memref<1x128xf32, #tpu.memory_space<vmem>>) target_semaphore(%34 : memref<!tpu.dma_semaphore, #tpu.memory_space<semaphore_mem>>)
    %c5 = arith.constant 5 : index
    %35 = memref.load %arg0[%c5] : memref<8xi32, #tpu.memory_space<smem>>
    %c0_i32_24 = arith.constant 0 : i32
    %36 = arith.maxsi %35, %c0_i32_24 : i32
    %c255_i32_25 = arith.constant 255 : i32
    %37 = arith.minsi %36, %c255_i32_25 : i32
    %c5_i32 = arith.constant 5 : i32
    %c0_i32_26 = arith.constant 0 : i32
    %38 = tpu.memref_slice %arg1[%37, %c0_i32_26] : memref<256x128xf32, #tpu.memory_space<any>> -> memref<1x128xf32, #tpu.memory_space<any>>
    %c5_i32_27 = arith.constant 5 : i32
    %c0_i32_28 = arith.constant 0 : i32
    %39 = tpu.memref_slice %arg11[%c5_i32_27, %c0_i32_28] : memref<8x128xf32, #tpu.memory_space<vmem>> -> memref<1x128xf32, #tpu.memory_space<vmem>>
    %40 = tpu.memref_slice %arg12[%c5_i32] : memref<8x!tpu.dma_semaphore, #tpu.memory_space<semaphore_mem>> -> memref<1x!tpu.dma_semaphore, #tpu.memory_space<semaphore_mem>>
    %41 = tpu.memref_squeeze %40 : memref<1x!tpu.dma_semaphore, #tpu.memory_space<semaphore_mem>> -> memref<!tpu.dma_semaphore, #tpu.memory_space<semaphore_mem>>
    tpu.enqueue_dma source(%38 : memref<1x128xf32, #tpu.memory_space<any>>) target(%39 : memref<1x128xf32, #tpu.memory_space<vmem>>) target_semaphore(%41 : memref<!tpu.dma_semaphore, #tpu.memory_space<semaphore_mem>>)
    %c6 = arith.constant 6 : index
    %42 = memref.load %arg0[%c6] : memref<8xi32, #tpu.memory_space<smem>>
    %c0_i32_29 = arith.constant 0 : i32
    %43 = arith.maxsi %42, %c0_i32_29 : i32
    %c255_i32_30 = arith.constant 255 : i32
    %44 = arith.minsi %43, %c255_i32_30 : i32
    %c6_i32 = arith.constant 6 : i32
    %c0_i32_31 = arith.constant 0 : i32
    %45 = tpu.memref_slice %arg1[%44, %c0_i32_31] : memref<256x128xf32, #tpu.memory_space<any>> -> memref<1x128xf32, #tpu.memory_space<any>>
    %c6_i32_32 = arith.constant 6 : i32
    %c0_i32_33 = arith.constant 0 : i32
    %46 = tpu.memref_slice %arg11[%c6_i32_32, %c0_i32_33] : memref<8x128xf32, #tpu.memory_space<vmem>> -> memref<1x128xf32, #tpu.memory_space<vmem>>
    %47 = tpu.memref_slice %arg12[%c6_i32] : memref<8x!tpu.dma_semaphore, #tpu.memory_space<semaphore_mem>> -> memref<1x!tpu.dma_semaphore, #tpu.memory_space<semaphore_mem>>
    %48 = tpu.memref_squeeze %47 : memref<1x!tpu.dma_semaphore, #tpu.memory_space<semaphore_mem>> -> memref<!tpu.dma_semaphore, #tpu.memory_space<semaphore_mem>>
    tpu.enqueue_dma source(%45 : memref<1x128xf32, #tpu.memory_space<any>>) target(%46 : memref<1x128xf32, #tpu.memory_space<vmem>>) target_semaphore(%48 : memref<!tpu.dma_semaphore, #tpu.memory_space<semaphore_mem>>)
    %c7 = arith.constant 7 : index
    %49 = memref.load %arg0[%c7] : memref<8xi32, #tpu.memory_space<smem>>
    %c0_i32_34 = arith.constant 0 : i32
    %50 = arith.maxsi %49, %c0_i32_34 : i32
    %c255_i32_35 = arith.constant 255 : i32
    %51 = arith.minsi %50, %c255_i32_35 : i32
    %c7_i32 = arith.constant 7 : i32
    %c0_i32_36 = arith.constant 0 : i32
    %52 = tpu.memref_slice %arg1[%51, %c0_i32_36] : memref<256x128xf32, #tpu.memory_space<any>> -> memref<1x128xf32, #tpu.memory_space<any>>
    %c7_i32_37 = arith.constant 7 : i32
    %c0_i32_38 = arith.constant 0 : i32
    %53 = tpu.memref_slice %arg11[%c7_i32_37, %c0_i32_38] : memref<8x128xf32, #tpu.memory_space<vmem>> -> memref<1x128xf32, #tpu.memory_space<vmem>>
    %54 = tpu.memref_slice %arg12[%c7_i32] : memref<8x!tpu.dma_semaphore, #tpu.memory_space<semaphore_mem>> -> memref<1x!tpu.dma_semaphore, #tpu.memory_space<semaphore_mem>>
    %55 = tpu.memref_squeeze %54 : memref<1x!tpu.dma_semaphore, #tpu.memory_space<semaphore_mem>> -> memref<!tpu.dma_semaphore, #tpu.memory_space<semaphore_mem>>
    tpu.enqueue_dma source(%52 : memref<1x128xf32, #tpu.memory_space<any>>) target(%53 : memref<1x128xf32, #tpu.memory_space<vmem>>) target_semaphore(%55 : memref<!tpu.dma_semaphore, #tpu.memory_space<semaphore_mem>>)
    %c0_i32_39 = arith.constant 0 : i32
    %c0_i32_40 = arith.constant 0 : i32
    %56 = tpu.memref_slice %arg1[%2, %c0_i32_40] : memref<256x128xf32, #tpu.memory_space<any>> -> memref<1x128xf32, #tpu.memory_space<any>>
    %c0_i32_41 = arith.constant 0 : i32
    %c0_i32_42 = arith.constant 0 : i32
    %57 = tpu.memref_slice %arg11[%c0_i32_41, %c0_i32_42] : memref<8x128xf32, #tpu.memory_space<vmem>> -> memref<1x128xf32, #tpu.memory_space<vmem>>
    %58 = tpu.memref_slice %arg12[%c0_i32_39] : memref<8x!tpu.dma_semaphore, #tpu.memory_space<semaphore_mem>> -> memref<1x!tpu.dma_semaphore, #tpu.memory_space<semaphore_mem>>
    %59 = tpu.memref_squeeze %58 : memref<1x!tpu.dma_semaphore, #tpu.memory_space<semaphore_mem>> -> memref<!tpu.dma_semaphore, #tpu.memory_space<semaphore_mem>>
    tpu.wait_dma2 semaphore(%59 : memref<!tpu.dma_semaphore, #tpu.memory_space<semaphore_mem>>) src(%56 : memref<1x128xf32, #tpu.memory_space<any>>) dst(%57 : memref<1x128xf32, #tpu.memory_space<vmem>>)
    %c1_i32_43 = arith.constant 1 : i32
    %c0_i32_44 = arith.constant 0 : i32
    %60 = tpu.memref_slice %arg1[%9, %c0_i32_44] : memref<256x128xf32, #tpu.memory_space<any>> -> memref<1x128xf32, #tpu.memory_space<any>>
    %c1_i32_45 = arith.constant 1 : i32
    %c0_i32_46 = arith.constant 0 : i32
    %61 = tpu.memref_slice %arg11[%c1_i32_45, %c0_i32_46] : memref<8x128xf32, #tpu.memory_space<vmem>> -> memref<1x128xf32, #tpu.memory_space<vmem>>
    %62 = tpu.memref_slice %arg12[%c1_i32_43] : memref<8x!tpu.dma_semaphore, #tpu.memory_space<semaphore_mem>> -> memref<1x!tpu.dma_semaphore, #tpu.memory_space<semaphore_mem>>
    %63 = tpu.memref_squeeze %62 : memref<1x!tpu.dma_semaphore, #tpu.memory_space<semaphore_mem>> -> memref<!tpu.dma_semaphore, #tpu.memory_space<semaphore_mem>>
    tpu.wait_dma2 semaphore(%63 : memref<!tpu.dma_semaphore, #tpu.memory_space<semaphore_mem>>) src(%60 : memref<1x128xf32, #tpu.memory_space<any>>) dst(%61 : memref<1x128xf32, #tpu.memory_space<vmem>>)
    %c2_i32_47 = arith.constant 2 : i32
    %c0_i32_48 = arith.constant 0 : i32
    %64 = tpu.memref_slice %arg1[%16, %c0_i32_48] : memref<256x128xf32, #tpu.memory_space<any>> -> memref<1x128xf32, #tpu.memory_space<any>>
    %c2_i32_49 = arith.constant 2 : i32
    %c0_i32_50 = arith.constant 0 : i32
    %65 = tpu.memref_slice %arg11[%c2_i32_49, %c0_i32_50] : memref<8x128xf32, #tpu.memory_space<vmem>> -> memref<1x128xf32, #tpu.memory_space<vmem>>
    %66 = tpu.memref_slice %arg12[%c2_i32_47] : memref<8x!tpu.dma_semaphore, #tpu.memory_space<semaphore_mem>> -> memref<1x!tpu.dma_semaphore, #tpu.memory_space<semaphore_mem>>
    %67 = tpu.memref_squeeze %66 : memref<1x!tpu.dma_semaphore, #tpu.memory_space<semaphore_mem>> -> memref<!tpu.dma_semaphore, #tpu.memory_space<semaphore_mem>>
    tpu.wait_dma2 semaphore(%67 : memref<!tpu.dma_semaphore, #tpu.memory_space<semaphore_mem>>) src(%64 : memref<1x128xf32, #tpu.memory_space<any>>) dst(%65 : memref<1x128xf32, #tpu.memory_space<vmem>>)
    %c3_i32_51 = arith.constant 3 : i32
    %c0_i32_52 = arith.constant 0 : i32
    %68 = tpu.memref_slice %arg1[%23, %c0_i32_52] : memref<256x128xf32, #tpu.memory_space<any>> -> memref<1x128xf32, #tpu.memory_space<any>>
    %c3_i32_53 = arith.constant 3 : i32
    %c0_i32_54 = arith.constant 0 : i32
    %69 = tpu.memref_slice %arg11[%c3_i32_53, %c0_i32_54] : memref<8x128xf32, #tpu.memory_space<vmem>> -> memref<1x128xf32, #tpu.memory_space<vmem>>
    %70 = tpu.memref_slice %arg12[%c3_i32_51] : memref<8x!tpu.dma_semaphore, #tpu.memory_space<semaphore_mem>> -> memref<1x!tpu.dma_semaphore, #tpu.memory_space<semaphore_mem>>
    %71 = tpu.memref_squeeze %70 : memref<1x!tpu.dma_semaphore, #tpu.memory_space<semaphore_mem>> -> memref<!tpu.dma_semaphore, #tpu.memory_space<semaphore_mem>>
    tpu.wait_dma2 semaphore(%71 : memref<!tpu.dma_semaphore, #tpu.memory_space<semaphore_mem>>) src(%68 : memref<1x128xf32, #tpu.memory_space<any>>) dst(%69 : memref<1x128xf32, #tpu.memory_space<vmem>>)
    %c4_i32_55 = arith.constant 4 : i32
    %c0_i32_56 = arith.constant 0 : i32
    %72 = tpu.memref_slice %arg1[%30, %c0_i32_56] : memref<256x128xf32, #tpu.memory_space<any>> -> memref<1x128xf32, #tpu.memory_space<any>>
    %c4_i32_57 = arith.constant 4 : i32
    %c0_i32_58 = arith.constant 0 : i32
    %73 = tpu.memref_slice %arg11[%c4_i32_57, %c0_i32_58] : memref<8x128xf32, #tpu.memory_space<vmem>> -> memref<1x128xf32, #tpu.memory_space<vmem>>
    %74 = tpu.memref_slice %arg12[%c4_i32_55] : memref<8x!tpu.dma_semaphore, #tpu.memory_space<semaphore_mem>> -> memref<1x!tpu.dma_semaphore, #tpu.memory_space<semaphore_mem>>
    %75 = tpu.memref_squeeze %74 : memref<1x!tpu.dma_semaphore, #tpu.memory_space<semaphore_mem>> -> memref<!tpu.dma_semaphore, #tpu.memory_space<semaphore_mem>>
    tpu.wait_dma2 semaphore(%75 : memref<!tpu.dma_semaphore, #tpu.memory_space<semaphore_mem>>) src(%72 : memref<1x128xf32, #tpu.memory_space<any>>) dst(%73 : memref<1x128xf32, #tpu.memory_space<vmem>>)
    %c5_i32_59 = arith.constant 5 : i32
    %c0_i32_60 = arith.constant 0 : i32
    %76 = tpu.memref_slice %arg1[%37, %c0_i32_60] : memref<256x128xf32, #tpu.memory_space<any>> -> memref<1x128xf32, #tpu.memory_space<any>>
    %c5_i32_61 = arith.constant 5 : i32
    %c0_i32_62 = arith.constant 0 : i32
    %77 = tpu.memref_slice %arg11[%c5_i32_61, %c0_i32_62] : memref<8x128xf32, #tpu.memory_space<vmem>> -> memref<1x128xf32, #tpu.memory_space<vmem>>
    %78 = tpu.memref_slice %arg12[%c5_i32_59] : memref<8x!tpu.dma_semaphore, #tpu.memory_space<semaphore_mem>> -> memref<1x!tpu.dma_semaphore, #tpu.memory_space<semaphore_mem>>
    %79 = tpu.memref_squeeze %78 : memref<1x!tpu.dma_semaphore, #tpu.memory_space<semaphore_mem>> -> memref<!tpu.dma_semaphore, #tpu.memory_space<semaphore_mem>>
    tpu.wait_dma2 semaphore(%79 : memref<!tpu.dma_semaphore, #tpu.memory_space<semaphore_mem>>) src(%76 : memref<1x128xf32, #tpu.memory_space<any>>) dst(%77 : memref<1x128xf32, #tpu.memory_space<vmem>>)
    %c6_i32_63 = arith.constant 6 : i32
    %c0_i32_64 = arith.constant 0 : i32
    %80 = tpu.memref_slice %arg1[%44, %c0_i32_64] : memref<256x128xf32, #tpu.memory_space<any>> -> memref<1x128xf32, #tpu.memory_space<any>>
    %c6_i32_65 = arith.constant 6 : i32
    %c0_i32_66 = arith.constant 0 : i32
    %81 = tpu.memref_slice %arg11[%c6_i32_65, %c0_i32_66] : memref<8x128xf32, #tpu.memory_space<vmem>> -> memref<1x128xf32, #tpu.memory_space<vmem>>
    %82 = tpu.memref_slice %arg12[%c6_i32_63] : memref<8x!tpu.dma_semaphore, #tpu.memory_space<semaphore_mem>> -> memref<1x!tpu.dma_semaphore, #tpu.memory_space<semaphore_mem>>
    %83 = tpu.memref_squeeze %82 : memref<1x!tpu.dma_semaphore, #tpu.memory_space<semaphore_mem>> -> memref<!tpu.dma_semaphore, #tpu.memory_space<semaphore_mem>>
    tpu.wait_dma2 semaphore(%83 : memref<!tpu.dma_semaphore, #tpu.memory_space<semaphore_mem>>) src(%80 : memref<1x128xf32, #tpu.memory_space<any>>) dst(%81 : memref<1x128xf32, #tpu.memory_space<vmem>>)
    %c7_i32_67 = arith.constant 7 : i32
    %c0_i32_68 = arith.constant 0 : i32
    %84 = tpu.memref_slice %arg1[%51, %c0_i32_68] : memref<256x128xf32, #tpu.memory_space<any>> -> memref<1x128xf32, #tpu.memory_space<any>>
    %c7_i32_69 = arith.constant 7 : i32
    %c0_i32_70 = arith.constant 0 : i32
    %85 = tpu.memref_slice %arg11[%c7_i32_69, %c0_i32_70] : memref<8x128xf32, #tpu.memory_space<vmem>> -> memref<1x128xf32, #tpu.memory_space<vmem>>
    %86 = tpu.memref_slice %arg12[%c7_i32_67] : memref<8x!tpu.dma_semaphore, #tpu.memory_space<semaphore_mem>> -> memref<1x!tpu.dma_semaphore, #tpu.memory_space<semaphore_mem>>
    %87 = tpu.memref_squeeze %86 : memref<1x!tpu.dma_semaphore, #tpu.memory_space<semaphore_mem>> -> memref<!tpu.dma_semaphore, #tpu.memory_space<semaphore_mem>>
    tpu.wait_dma2 semaphore(%87 : memref<!tpu.dma_semaphore, #tpu.memory_space<semaphore_mem>>) src(%84 : memref<1x128xf32, #tpu.memory_space<any>>) dst(%85 : memref<1x128xf32, #tpu.memory_space<vmem>>)
    %c0_71 = arith.constant 0 : index
    %c0_72 = arith.constant 0 : index
    %88 = vector.load %arg11[%c0_71, %c0_72] : memref<8x128xf32, #tpu.memory_space<vmem>>, vector<8x128xf32>
    %c0_73 = arith.constant 0 : index
    %c0_74 = arith.constant 0 : index
    %c0_75 = arith.constant 0 : index
    %89 = vector.load %arg2[%c0_73, %c0_74, %c0_75] : memref<2x8x128xf32, #tpu.memory_space<vmem>>, vector<1x8x128xf32>
    %90 = vector.shape_cast %89 : vector<1x8x128xf32> to vector<8x128xf32>
    %c0_76 = arith.constant 0 : index
    %c0_77 = arith.constant 0 : index
    %c0_78 = arith.constant 0 : index
    %91 = vector.load %arg3[%c0_76, %c0_77, %c0_78] : memref<2x8x128xf32, #tpu.memory_space<vmem>>, vector<1x8x128xf32>
    %92 = vector.shape_cast %91 : vector<1x8x128xf32> to vector<8x128xf32>
    %93 = tpu.concatenate %88, %90 in 1 : vector<8x128xf32>, vector<8x128xf32> -> vector<8x256xf32>
    %94 = arith.truncf %93 : vector<8x256xf32> to vector<8x256xbf16>
    %c0_79 = arith.constant 0 : index
    %c0_80 = arith.constant 0 : index
    %c0_81 = arith.constant 0 : index
    %95 = vector.load %arg4[%c0_79, %c0_80, %c0_81] : memref<2x256x512xbf16, #tpu.memory_space<vmem>>, vector<1x256x512xbf16>
    %96 = vector.shape_cast %95 : vector<1x256x512xbf16> to vector<256x512xbf16>
    %cst = arith.constant dense<0.000000e+00> : vector<8x512xf32>
    %97 = tpu.matmul %94, %96, %cst {dimension_numbers = #tpu.dot_dimension_numbers<[1], [0], [0], [1], [0, 0, 1, 1], [], []>} : vector<8x256xbf16>, vector<256x512xbf16>, vector<8x512xf32> -> vector<8x512xf32>
    %c0_82 = arith.constant 0 : index
    %c0_83 = arith.constant 0 : index
    %c0_84 = arith.constant 0 : index
    %98 = vector.load %arg5[%c0_82, %c0_83, %c0_84] : memref<2x1x512xf32, #tpu.memory_space<vmem>>, vector<1x1x512xf32>
    %99 = vector.shape_cast %98 : vector<1x1x512xf32> to vector<1x512xf32>
    %100 = vector.broadcast %99 : vector<1x512xf32> to vector<8x512xf32>
    %101 = arith.addf %97, %100 : vector<8x512xf32>
    %102 = vector.extract_strided_slice %101 {offsets = [0, 0], sizes = [8, 128], strides = [1, 1]} : vector<8x512xf32> to vector<8x128xf32>
    %103 = arith.negf %102 : vector<8x128xf32>
    %104 = math.exp %103 : vector<8x128xf32>
    %cst_85 = arith.constant 1.000000e+00 : f32
    %105 = vector.broadcast %cst_85 : f32 to vector<8x128xf32>
    %106 = arith.addf %105, %104 : vector<8x128xf32>
    %107 = arith.divf %105, %106 : vector<8x128xf32>
    %108 = vector.extract_strided_slice %101 {offsets = [0, 128], sizes = [8, 128], strides = [1, 1]} : vector<8x512xf32> to vector<8x128xf32>
    %109 = arith.negf %108 : vector<8x128xf32>
    %110 = math.exp %109 : vector<8x128xf32>
    %cst_86 = arith.constant 1.000000e+00 : f32
    %111 = vector.broadcast %cst_86 : f32 to vector<8x128xf32>
    %112 = arith.addf %111, %110 : vector<8x128xf32>
    %113 = arith.divf %111, %112 : vector<8x128xf32>
    %114 = vector.extract_strided_slice %101 {offsets = [0, 256], sizes = [8, 128], strides = [1, 1]} : vector<8x512xf32> to vector<8x128xf32>
    %115 = math.tanh %114 : vector<8x128xf32>
    %116 = vector.extract_strided_slice %101 {offsets = [0, 384], sizes = [8, 128], strides = [1, 1]} : vector<8x512xf32> to vector<8x128xf32>
    %117 = arith.negf %116 : vector<8x128xf32>
    %118 = math.exp %117 : vector<8x128xf32>
    %cst_87 = arith.constant 1.000000e+00 : f32
    %119 = vector.broadcast %cst_87 : f32 to vector<8x128xf32>
    %120 = arith.addf %119, %118 : vector<8x128xf32>
    %121 = arith.divf %119, %120 : vector<8x128xf32>
    %122 = arith.mulf %113, %92 : vector<8x128xf32>
    %123 = arith.mulf %107, %115 : vector<8x128xf32>
    %124 = arith.addf %122, %123 : vector<8x128xf32>
    %125 = math.tanh %124 : vector<8x128xf32>
    %126 = arith.mulf %121, %125 : vector<8x128xf32>
    %c0_88 = arith.constant 0 : index
    %c0_89 = arith.constant 0 : index
    %c0_90 = arith.constant 0 : index
    %127 = vector.load %arg9[%c0_88, %c0_89, %c0_90] : memref<2x8x128xf32, #tpu.memory_space<vmem>>, vector<1x8x128xf32>
    %128 = vector.shape_cast %127 : vector<1x8x128xf32> to vector<8x128xf32>
    %129 = vector.shape_cast %126 : vector<8x128xf32> to vector<1x8x128xf32>
    tpu.vector_store %arg9[%c0_88, %c0_89, %c0_90], %129 {strides = array<i32>} : memref<2x8x128xf32, #tpu.memory_space<vmem>>, vector<1x8x128xf32>,
    %c0_91 = arith.constant 0 : index
    %c0_92 = arith.constant 0 : index
    %c0_93 = arith.constant 0 : index
    %130 = vector.load %arg10[%c0_91, %c0_92, %c0_93] : memref<2x8x128xf32, #tpu.memory_space<vmem>>, vector<1x8x128xf32>
    %131 = vector.shape_cast %130 : vector<1x8x128xf32> to vector<8x128xf32>
    %132 = vector.shape_cast %124 : vector<8x128xf32> to vector<1x8x128xf32>
    tpu.vector_store %arg10[%c0_91, %c0_92, %c0_93], %132 {strides = array<i32>} : memref<2x8x128xf32, #tpu.memory_space<vmem>>, vector<1x8x128xf32>,
    %c1_94 = arith.constant 1 : index
    %c0_95 = arith.constant 0 : index
    %c0_96 = arith.constant 0 : index
    %133 = vector.load %arg2[%c1_94, %c0_95, %c0_96] : memref<2x8x128xf32, #tpu.memory_space<vmem>>, vector<1x8x128xf32>
    %134 = vector.shape_cast %133 : vector<1x8x128xf32> to vector<8x128xf32>
    %c1_97 = arith.constant 1 : index
    %c0_98 = arith.constant 0 : index
    %c0_99 = arith.constant 0 : index
    %135 = vector.load %arg3[%c1_97, %c0_98, %c0_99] : memref<2x8x128xf32, #tpu.memory_space<vmem>>, vector<1x8x128xf32>
    %136 = vector.shape_cast %135 : vector<1x8x128xf32> to vector<8x128xf32>
    %137 = tpu.concatenate %126, %134 in 1 : vector<8x128xf32>, vector<8x128xf32> -> vector<8x256xf32>
    %138 = arith.truncf %137 : vector<8x256xf32> to vector<8x256xbf16>
    %c1_100 = arith.constant 1 : index
    %c0_101 = arith.constant 0 : index
    %c0_102 = arith.constant 0 : index
    %139 = vector.load %arg4[%c1_100, %c0_101, %c0_102] : memref<2x256x512xbf16, #tpu.memory_space<vmem>>, vector<1x256x512xbf16>
    %140 = vector.shape_cast %139 : vector<1x256x512xbf16> to vector<256x512xbf16>
    %cst_103 = arith.constant dense<0.000000e+00> : vector<8x512xf32>
    %141 = tpu.matmul %138, %140, %cst_103 {dimension_numbers = #tpu.dot_dimension_numbers<[1], [0], [0], [1], [0, 0, 1, 1], [], []>} : vector<8x256xbf16>, vector<256x512xbf16>, vector<8x512xf32> -> vector<8x512xf32>
    %c1_104 = arith.constant 1 : index
    %c0_105 = arith.constant 0 : index
    %c0_106 = arith.constant 0 : index
    %142 = vector.load %arg5[%c1_104, %c0_105, %c0_106] : memref<2x1x512xf32, #tpu.memory_space<vmem>>, vector<1x1x512xf32>
    %143 = vector.shape_cast %142 : vector<1x1x512xf32> to vector<1x512xf32>
    %144 = vector.broadcast %143 : vector<1x512xf32> to vector<8x512xf32>
    %145 = arith.addf %141, %144 : vector<8x512xf32>
    %146 = vector.extract_strided_slice %145 {offsets = [0, 0], sizes = [8, 128], strides = [1, 1]} : vector<8x512xf32> to vector<8x128xf32>
    %147 = arith.negf %146 : vector<8x128xf32>
    %148 = math.exp %147 : vector<8x128xf32>
    %cst_107 = arith.constant 1.000000e+00 : f32
    %149 = vector.broadcast %cst_107 : f32 to vector<8x128xf32>
    %150 = arith.addf %149, %148 : vector<8x128xf32>
    %151 = arith.divf %149, %150 : vector<8x128xf32>
    %152 = vector.extract_strided_slice %145 {offsets = [0, 128], sizes = [8, 128], strides = [1, 1]} : vector<8x512xf32> to vector<8x128xf32>
    %153 = arith.negf %152 : vector<8x128xf32>
    %154 = math.exp %153 : vector<8x128xf32>
    %cst_108 = arith.constant 1.000000e+00 : f32
    %155 = vector.broadcast %cst_108 : f32 to vector<8x128xf32>
    %156 = arith.addf %155, %154 : vector<8x128xf32>
    %157 = arith.divf %155, %156 : vector<8x128xf32>
    %158 = vector.extract_strided_slice %145 {offsets = [0, 256], sizes = [8, 128], strides = [1, 1]} : vector<8x512xf32> to vector<8x128xf32>
    %159 = math.tanh %158 : vector<8x128xf32>
    %160 = vector.extract_strided_slice %145 {offsets = [0, 384], sizes = [8, 128], strides = [1, 1]} : vector<8x512xf32> to vector<8x128xf32>
    %161 = arith.negf %160 : vector<8x128xf32>
    %162 = math.exp %161 : vector<8x128xf32>
    %cst_109 = arith.constant 1.000000e+00 : f32
    %163 = vector.broadcast %cst_109 : f32 to vector<8x128xf32>
    %164 = arith.addf %163, %162 : vector<8x128xf32>
    %165 = arith.divf %163, %164 : vector<8x128xf32>
    %166 = arith.mulf %157, %136 : vector<8x128xf32>
    %167 = arith.mulf %151, %159 : vector<8x128xf32>
    %168 = arith.addf %166, %167 : vector<8x128xf32>
    %169 = math.tanh %168 : vector<8x128xf32>
    %170 = arith.mulf %165, %169 : vector<8x128xf32>
    %c1_110 = arith.constant 1 : index
    %c0_111 = arith.constant 0 : index
    %c0_112 = arith.constant 0 : index
    %171 = vector.load %arg9[%c1_110, %c0_111, %c0_112] : memref<2x8x128xf32, #tpu.memory_space<vmem>>, vector<1x8x128xf32>
    %172 = vector.shape_cast %171 : vector<1x8x128xf32> to vector<8x128xf32>
    %173 = vector.shape_cast %170 : vector<8x128xf32> to vector<1x8x128xf32>
    tpu.vector_store %arg9[%c1_110, %c0_111, %c0_112], %173 {strides = array<i32>} : memref<2x8x128xf32, #tpu.memory_space<vmem>>, vector<1x8x128xf32>,
    %c1_113 = arith.constant 1 : index
    %c0_114 = arith.constant 0 : index
    %c0_115 = arith.constant 0 : index
    %174 = vector.load %arg10[%c1_113, %c0_114, %c0_115] : memref<2x8x128xf32, #tpu.memory_space<vmem>>, vector<1x8x128xf32>
    %175 = vector.shape_cast %174 : vector<1x8x128xf32> to vector<8x128xf32>
    %176 = vector.shape_cast %168 : vector<8x128xf32> to vector<1x8x128xf32>
    tpu.vector_store %arg10[%c1_113, %c0_114, %c0_115], %176 {strides = array<i32>} : memref<2x8x128xf32, #tpu.memory_space<vmem>>, vector<1x8x128xf32>,
    %177 = arith.truncf %170 : vector<8x128xf32> to vector<8x128xbf16>
    %c0_116 = arith.constant 0 : index
    %c0_117 = arith.constant 0 : index
    %178 = vector.load %arg6[%c0_116, %c0_117] : memref<128x256xbf16, #tpu.memory_space<vmem>>, vector<128x256xbf16>
    %cst_118 = arith.constant dense<0.000000e+00> : vector<8x256xf32>
    %179 = tpu.matmul %177, %178, %cst_118 {dimension_numbers = #tpu.dot_dimension_numbers<[1], [0], [0], [1], [0, 0, 1, 1], [], []>} : vector<8x128xbf16>, vector<128x256xbf16>, vector<8x256xf32> -> vector<8x256xf32>
    %c0_119 = arith.constant 0 : index
    %c0_120 = arith.constant 0 : index
    %180 = vector.load %arg7[%c0_119, %c0_120] : memref<1x256xf32, #tpu.memory_space<vmem>>, vector<1x256xf32>
    %181 = vector.broadcast %180 : vector<1x256xf32> to vector<8x256xf32>
    %182 = arith.addf %179, %181 : vector<8x256xf32>
    %c0_121 = arith.constant 0 : index
    %c0_122 = arith.constant 0 : index
    %183 = vector.load %arg8[%c0_121, %c0_122] : memref<8x256xf32, #tpu.memory_space<vmem>>, vector<8x256xf32>
    tpu.vector_store %arg8[%c0_121, %c0_122], %182 {strides = array<i32>} : memref<8x256xf32, #tpu.memory_space<vmem>>, vector<8x256xf32>,
    return
  }
}

</mosaic_0001>

<bundles_post_ra>
// kernel: decoder_rnn_step.1
= control target key start
LH: loop header
LB: loop body
LE: loop exit
PB: predicated region body
PF: predicated region fallthrough
CT: control target
= control target key end

     0   :  { %16 = vsyncpa [#allocation7], 0  ;;  %s2835_s0 = inlined_call_operand.vmem [shape: s32[8], index: 0, kind: input, shape index: {}]   ;;  %s2836_s1 = inlined_call_operand.hbm [shape: f32[256,128], index: 1, kind: input, shape index: {}]   ;;  %s2837_s2 = inlined_call_operand.hbm [shape: f32[2,8,128], index: 2, kind: input, shape index: {}, may-alias: {2,9}]   ;;  %s2838_s3 = inlined_call_operand.hbm [shape: f32[2,8,128], index: 3, kind: input, shape index: {}, may-alias: {3,10}]   ;;  %s2839_s4 = inlined_call_operand.hbm [shape: bf16[2,256,512], index: 4, kind: input, shape index: {}]   ;;  %s2840_s5 = inlined_call_operand.vmem [shape: f32[2,1,512], index: 5, kind: input, shape index: {}]   ;;  %s2841_s6 = inlined_call_operand.hbm [shape: bf16[128,256], index: 6, kind: input, shape index: {}]   ;;  %s2842_s7 = inlined_call_operand.vmem [shape: f32[1,256], index: 7, kind: input, shape index: {}]   ;;  %s2843_s8 = inlined_call_operand.hbm [shape: f32[8,256], index: 8, kind: output, shape index: {0}]   ;;  %s2844_s9 = inlined_call_operand.hbm [shape: f32[2,8,128], index: 9, kind: output, shape index: {1}, may-alias: {2,9}]   ;;  %s2845_s10 = inlined_call_operand.hbm [shape: f32[2,8,128], index: 10, kind: output, shape index: {2}, may-alias: {3,10}]  }
   0x1   :  { %17 = vsyncpa [#allocation5], 0 }
   0x2   :  { %18 = vsyncpa [#allocation10], 0 }
   0x3   :  { %19 = vsyncpa [#allocation13], 0 }
   0x4   :  { %20 = vsyncpa [#allocation6], 0 }
   0x5   :  { %21 = vsyncpa [#allocation16], 0  ;;  %s28_s15 = sshll.u32 %s2835_s0, 4  ;;  %s2476_s16 = smov [#allocation9]   ;;  %s29_s15 = int_to_ptr.vmem [resolvable:$true] %s28_s15 }
   0x6   :  { %s49_s17 = sshll.u32 %s2476_s16, 4  ;;  %s2090_s20 = scalar_lea.hbm %s2838_s3, 256  ;;  %s50_s17 = int_to_ptr.vmem [resolvable:$true] %s49_s17 }
   0x7   :  { %p2091_p0 = scmp.ne.s32.totalorder %s2838_s3, %s2090_s20  ;;  %p2094_p1 = scmp.lt.u32.totalorder %s2090_s20, %s2838_s3 }
   0x9   :  { %p2096_p2 = pnand %p2094_p1, %p2091_p0 }
   0xb   :  { %2099 = shalt.err (!%p2096_p2)
}
   0xc   :  { %s2100_s25 = scalar_lea.vmem %s50_s17, 256  ;;  %p2105_p4 = scmp.lt.s32.totalorder %s50_s17, %s50_s17 }
   0xd   :  { %p2101_p3 = scmp.ne.s32.totalorder %s50_s17, %s2100_s25  ;;  %p2106_p5 = scmp.lt.s32.totalorder %s2100_s25, %s2100_s25 }
   0xf   :  { %p2107_p6 = por %p2106_p5, %p2105_p4 }
  0x11   :  { %p2108_p7 = pnand %p2107_p6, %p2101_p3 }
  0x13   :  { %2111 = shalt.err (!%p2108_p7)
}
  0x14   :  { %s2477_s0 = smov 128   ;;  %s2478_s26 = smov 8  }
  0x15   :  { %55 = dma.hbm_to_vmem [thread:$0]  %s2838_s3, 256, %s50_s17, [#allocation10], %s2477_s0, %s2477_s0, %s2478_s26  }
  0x16   :  { %s2112_s29 = scalar_lea.vmem %s29_s15, 16  ;;  %p2117_p9 = scmp.lt.s32.totalorder %s29_s15, %s29_s15 }
  0x17   :  { %p2113_p8 = scmp.ne.s32.totalorder %s29_s15, %s2112_s29  ;;  %p2118_p10 = scmp.lt.s32.totalorder %s2112_s29, %s2112_s29 }
  0x19   :  { %p2119_p11 = por %p2118_p10, %p2117_p9 }
  0x1b   :  { %p2120_p12 = pnand %p2119_p11, %p2113_p8 }
  0x1d   :  { %2123 = shalt.err (!%p2120_p12)
}
  0x1e   :  { %s2479_s30 = smov [#allocation4]   ;;  %s2480_s11 = smov [#allocation8]  }
  0x1f   :  { %31 = dma.vmem_to_smem %s29_s15, 16, %s2479_s30, [#allocation7]  }
  0x20   :  { %s37_s12 = sshll.u32 %s2480_s11, 4  ;;  %s2481_s13 = smov [#allocation11]   ;;  %s38_s12 = int_to_ptr.vmem [resolvable:$true] %s37_s12 }
  0x21   :  { %s61_s14 = sshll.u32 %s2481_s13, 4  ;;  %s2124_s3 = scalar_lea.hbm %s2837_s2, 256  ;;  %s2570_s14 = int_to_ptr.vmem [resolvable:$true] %s61_s14 }
  0x22   :  { %p2125_p13 = scmp.ne.s32.totalorder %s2837_s2, %s2124_s3  ;;  %p2128_p0 = scmp.lt.u32.totalorder %s2124_s3, %s2837_s2 }
  0x24   :  { %p2130_p1 = pnand %p2128_p0, %p2125_p13 }
  0x26   :  { %2133 = shalt.err (!%p2130_p1)
}
  0x27   :  { %s2134_s15 = scalar_lea.vmem %s38_s12, 256  ;;  %p2139_p3 = scmp.lt.s32.totalorder %s38_s12, %s38_s12 }
  0x28   :  { %p2135_p2 = scmp.ne.s32.totalorder %s38_s12, %s2134_s15  ;;  %p2140_p4 = scmp.lt.s32.totalorder %s2134_s15, %s2134_s15 }
  0x2a   :  { %p2141_p5 = por %p2140_p4, %p2139_p3 }
  0x2c   :  { %p2142_p6 = pnand %p2141_p5, %p2135_p2 }
  0x2e   :  { %2145 = shalt.err (!%p2142_p6)
}
  0x2f   :  { %43 = dma.hbm_to_vmem [thread:$0]  %s2837_s2, 256, %s38_s12, [#allocation5], %s2477_s0, %s2477_s0, %s2478_s26  }
  0x30   :  { %s2146_s27 = scalar_lea.hbm %s2839_s4, 16384 }
  0x31   :  { %p2147_p7 = scmp.ne.s32.totalorder %s2839_s4, %s2146_s27  ;;  %p2150_p8 = scmp.lt.u32.totalorder %s2146_s27, %s2839_s4 }
  0x33   :  { %p2152_p9 = pnand %p2150_p8, %p2147_p7 }
  0x35   :  { %2155 = shalt.err (!%p2152_p9)
}
  0x36   :  { %s2156_s13 = scalar_lea.vmem %s2570_s14, 16384  ;;  %p2161_p11 = scmp.lt.s32.totalorder %s2570_s14, %s2570_s14 }
  0x37   :  { %p2157_p10 = scmp.ne.s32.totalorder %s2570_s14, %s2156_s13  ;;  %p2162_p12 = scmp.lt.s32.totalorder %s2156_s13, %s2156_s13 }
  0x39   :  { %p2163_p13 = por %p2162_p12, %p2161_p11 }
  0x3b   :  { %p2164_p0 = pnand %p2163_p13, %p2157_p10 }
  0x3d   :  { %2167 = shalt.err (!%p2164_p0)
}
  0x3e   :  { %s2482_s2 = smov 256   ;;  %s2483_s12 = smov 16  }
  0x3f   :  { %67 = dma.hbm_to_vmem [thread:$0]  %s2839_s4, 16384, %s2570_s14, [#allocation10], %s2482_s2, %s2482_s2, %s2483_s12  }
  0x40   :  { %s2484_s3 = smov [#allocation12]   ;;  %s2168_s21 = scalar_lea.hbm %s2841_s6, 2048 }
  0x41   :  { %s75_s17 = sshll.u32 %s2484_s3, 4  ;;  %p2169_p1 = scmp.ne.s32.totalorder %s2841_s6, %s2168_s21  ;;  %s76_s17 = int_to_ptr.vmem [resolvable:$true] %s75_s17 }
  0x42   :  { %p2172_p2 = scmp.lt.u32.totalorder %s2168_s21, %s2841_s6 }
  0x44   :  { %p2174_p3 = pnand %p2172_p2, %p2169_p1 }
  0x46   :  { %2177 = shalt.err (!%p2174_p3)
}
  0x47   :  { %s2178_s25 = scalar_lea.vmem %s76_s17, 2048  ;;  %p2183_p5 = scmp.lt.s32.totalorder %s76_s17, %s76_s17 }
  0x48   :  { %p2179_p4 = scmp.ne.s32.totalorder %s76_s17, %s2178_s25  ;;  %p2184_p6 = scmp.lt.s32.totalorder %s2178_s25, %s2178_s25 }
  0x4a   :  { %p2185_p7 = por %p2184_p6, %p2183_p5 }
  0x4c   :  { %p2186_p8 = pnand %p2185_p7, %p2179_p4 }
  0x4e   :  { %2189 = shalt.err (!%p2186_p8)
}
  0x4f   :  { %81 = dma.hbm_to_vmem [thread:$0]  %s2841_s6, 2048, %s76_s17, [#allocation13], %s2477_s0, %s2477_s0, %s2478_s26  }
  0x50   :  { %2448 = dma.done.wait [#allocation7], 16  }
  0x51   :  { %2449 = vsyncadd [#allocation7], 4294967280 }
  0x52   :  { %2450 = dma.done.wait [#allocation5], 256  }
  0x53   :  { %2451 = vsyncadd [#allocation5], 4294967040 }
  0x54   :  { %2452 = dma.done.wait [#allocation10], 16640  }
  0x55   :  { %2453 = vsyncadd [#allocation10], 4294950656 }
  0x56   :  { %2454 = dma.done.wait [#allocation13], 2048  }
  0x57   :  { %2455 = vsyncadd [#allocation13], 4294965248 }
  0x58   :  { %99 = sfence }
  0x59   :  { %s101_s27 = sld [smem:[#allocation4]]  ;;  %s2485_s28 = smov [#allocation2]  }
  0x5a   :  { %s115_s29 = sshll.u32 %s2485_s28, 4  ;;  %s1597_s30 = sld [smem:[#allocation4 + $0x1]]  ;;  %s2619_s29 = int_to_ptr.vmem [resolvable:$true] %s115_s29 }
  0x5b   :  { %s2486_s11 = smov [#allocation2 + $0x1]   ;;  %s2621_s2 = sld [smem:[#allocation4 + $0x2]] }
  0x5c   :  { %s135_s13 = sshll.u32 %s2486_s11, 4  ;;  %s2487_s6 = smov [#allocation2 + $0x2]   ;;  %s2623_s13 = int_to_ptr.vmem [resolvable:$true] %s135_s13 }
  0x5d   :  { %s2625_s12 = sshll.u32 %s2487_s6, 4  ;;  %s2627_s16 = sld [smem:[#allocation4 + $0x3]]  ;;  %s156_s12 = int_to_ptr.vmem [resolvable:$true] %s2625_s12 }
  0x5e   :  { %s2636_s23 = scalar_lea.hbm %s2836_s1, 4096 }
  0x5f   :  { %p102_p9 = scmp.gt.s32.totalorder %s101_s27, 0  ;;  %p1591_p10 = scmp.lt.s32.totalorder %s101_s27, 255 }
  0x60   :  { %p120_p11 = scmp.gt.s32.totalorder %s1597_s30, 0  ;;  %p1598_p12 = scmp.lt.s32.totalorder %s1597_s30, 255 }
  0x61   :  { %s2848_s27 = smov (!%p102_p9, %s101_s27), 0  ;;  %p140_p13 = scmp.gt.s32.totalorder %s2621_s2, 0 }
  0x62   :  { %s2850_s30 = smov (!%p120_p11, %s1597_s30), 0  ;;  %s2852_s27 = smov (!%p1591_p10, %s2848_s27), 255 }
  0x63   :  { %s2854_s30 = smov (!%p1598_p12, %s2850_s30), 255  ;;  %s1596_s18 = sshll.u32 %s2852_s27, 4 }
  0x64   :  { %s107_s19 = scalar_lea.hbm %s2836_s1, %s1596_s18  ;;  %s1603_s20 = sshll.u32 %s2854_s30, 4 }
  0x65   :  { %s2190_s21 = scalar_lea.hbm %s107_s19, 16  ;;  %p2193_p1 = scmp.lt.u32.totalorder %s107_s19, %s2836_s1 }
  0x66   :  { %p2191_p0 = scmp.ne.s32.totalorder %s107_s19, %s2190_s21  ;;  %p2194_p2 = scmp.lt.u32.totalorder %s2636_s23, %s2190_s21 }
  0x67   :  { %p2196_p4 = scmp.lt.u32.totalorder %s2190_s21, %s107_s19 }
  0x68   :  { %p2195_p3 = por %p2194_p2, %p2193_p1 }
  0x6a   :  { %p2197_p5 = por %p2196_p4, %p2195_p3 }
  0x6c   :  { %p2198_p6 = pnand %p2197_p5, %p2191_p0 }
  0x6e   :  { %2201 = shalt.err (!%p2198_p6)  }
  0x6f   :  { %s2202_s4 = scalar_lea.vmem %s2619_s29, 16  ;;  %s2645_s14 = scalar_lea.vmem %s2619_s29, 128 }
  0x70   :  { %p2203_p7 = scmp.ne.s32.totalorder %s2619_s29, %s2202_s4  ;;  %p2207_p8 = scmp.lt.s32.totalorder %s2619_s29, %s2619_s29 }
  0x71   :  { %p2208_p9 = scmp.lt.s32.totalorder %s2645_s14, %s2202_s4 }
  0x73   :  { %p2209_p10 = por %p2208_p9, %p2207_p8 }
  0x75   :  { %p2210_p11 = pnand %p2209_p10, %p2203_p7 }
  0x77   :  { %2213 = shalt.err (!%p2210_p11)  }
  0x78   :  { %118 = dma.hbm_to_vmem [thread:$0]  %s107_s19, 16, %s2619_s29, [#allocation3] }
  0x79   :  { %s125_s30 = scalar_lea.hbm %s2836_s1, %s1603_s20  ;;  %p1605_p12 = scmp.lt.s32.totalorder %s2621_s2, 255 }
  0x7a   :  { %s2214_s11 = scalar_lea.hbm %s125_s30, 16  ;;  %p2217_p1 = scmp.lt.u32.totalorder %s125_s30, %s2836_s1 }
  0x7b   :  { %p2215_p0 = scmp.ne.s32.totalorder %s125_s30, %s2214_s11  ;;  %p2218_p2 = scmp.lt.u32.totalorder %s2636_s23, %s2214_s11 }
  0x7c   :  { %p2220_p4 = scmp.lt.u32.totalorder %s2214_s11, %s125_s30 }
  0x7d   :  { %p2219_p3 = por %p2218_p2, %p2217_p1 }
  0x7f   :  { %p2221_p5 = por %p2220_p4, %p2219_p3 }
  0x81   :  { %p2222_p6 = pnand %p2221_p5, %p2215_p0 }
  0x83   :  { %2225 = shalt.err (!%p2222_p6)  }
  0x84   :  { %s2226_s3 = scalar_lea.vmem %s2623_s13, 16  ;;  %p2231_p8 = scmp.lt.s32.totalorder %s2623_s13, %s2619_s29 }
  0x85   :  { %p2227_p7 = scmp.ne.s32.totalorder %s2623_s13, %s2226_s3  ;;  %p2232_p9 = scmp.lt.s32.totalorder %s2645_s14, %s2226_s3 }
  0x87   :  { %p2233_p10 = por %p2232_p9, %p2231_p8 }
  0x89   :  { %p2234_p11 = pnand %p2233_p10, %p2227_p7 }
  0x8b   :  { %2237 = shalt.err (!%p2234_p11)  }
  0x8c   :  { %138 = dma.hbm_to_vmem [thread:$0]  %s125_s30, 16, %s2623_s13, [#allocation3 + $0x1] }
  0x8d   :  { %s141_s17 = scalar_select %p140_p13, %s2621_s2, 0 }
  0x8e   :  { %p160_p0 = scmp.gt.s32.totalorder %s2627_s16, 0  ;;  %p1612_p1 = scmp.lt.s32.totalorder %s2627_s16, 255 }
  0x8f   :  { %s2856_s17 = smov (!%p1605_p12, %s141_s17), 255 }
  0x90   :  { %s161_s19 = scalar_select %p160_p0, %s2627_s16, 0 }
  0x91   :  { %s1610_s20 = sshll.u32 %s2856_s17, 4 }
  0x92   :  { %s145_s22 = scalar_lea.hbm %s2836_s1, %s1610_s20 }
  0x93   :  { %s2238_s24 = scalar_lea.hbm %s145_s22, 16  ;;  %p2241_p3 = scmp.lt.u32.totalorder %s145_s22, %s2836_s1 }
  0x94   :  { %p2239_p2 = scmp.ne.s32.totalorder %s145_s22, %s2238_s24  ;;  %p2242_p4 = scmp.lt.u32.totalorder %s2636_s23, %s2238_s24 }
  0x95   :  { %p2244_p13 = scmp.lt.u32.totalorder %s2238_s24, %s145_s22 }
  0x96   :  { %p2243_p5 = por %p2242_p4, %p2241_p3 }
  0x98   :  { %p2245_p6 = por %p2244_p13, %p2243_p5 }
  0x9a   :  { %p2246_p7 = pnand %p2245_p6, %p2239_p2 }
  0x9c   :  { %2249 = shalt.err (!%p2246_p7)  }
  0x9d   :  { %s2250_s13 = scalar_lea.vmem %s156_s12, 16  ;;  %p2255_p8 = scmp.lt.s32.totalorder %s156_s12, %s2619_s29 }
  0x9e   :  { %p2251_p12 = scmp.ne.s32.totalorder %s156_s12, %s2250_s13  ;;  %p2256_p9 = scmp.lt.s32.totalorder %s2645_s14, %s2250_s13 }
  0xa0   :  { %p2257_p10 = por %p2256_p9, %p2255_p8 }
  0xa2   :  { %p2258_p11 = pnand %p2257_p10, %p2251_p12 }
  0xa4   :  { %2261 = shalt.err (!%p2258_p11)  }
  0xa5   :  { %158 = dma.hbm_to_vmem [thread:$0]  %s145_s22, 16, %s156_s12, [#allocation3 + $0x2] }
  0xa6   :  { %s2858_s19 = smov (!%p1612_p1, %s161_s19), 255  ;;  %s2488_s2 = smov [#allocation2 + $0x3]  }
  0xa7   :  { %s175_s27 = sshll.u32 %s2488_s2, 4  ;;  %s2685_s28 = sld [smem:[#allocation4 + $0x4]]  ;;  %s176_s27 = int_to_ptr.vmem [resolvable:$true] %s175_s27 }
  0xa8   :  { %s1617_s30 = sshll.u32 %s2858_s19, 4 }
  0xa9   :  { %s165_s18 = scalar_lea.hbm %s2836_s1, %s1617_s30 }
  0xaa   :  { %s2262_s3 = scalar_lea.hbm %s165_s18, 16  ;;  %p2265_p2 = scmp.lt.u32.totalorder %s165_s18, %s2836_s1 }
  0xab   :  { %p2263_p0 = scmp.ne.s32.totalorder %s165_s18, %s2262_s3  ;;  %p2266_p3 = scmp.lt.u32.totalorder %s2636_s23, %s2262_s3 }
  0xac   :  { %p2268_p5 = scmp.lt.u32.totalorder %s2262_s3, %s165_s18 }
  0xad   :  { %p2267_p4 = por %p2266_p3, %p2265_p2 }
  0xaf   :  { %p2269_p1 = por %p2268_p5, %p2267_p4 }
  0xb1   :  { %p2270_p13 = pnand %p2269_p1, %p2263_p0 }
  0xb3   :  { %2273 = shalt.err (!%p2270_p13)  }
  0xb4   :  { %s2274_s12 = scalar_lea.vmem %s176_s27, 16  ;;  %p2279_p7 = scmp.lt.s32.totalorder %s176_s27, %s2619_s29 }
  0xb5   :  { %p2275_p6 = scmp.ne.s32.totalorder %s176_s27, %s2274_s12  ;;  %p2280_p12 = scmp.lt.s32.totalorder %s2645_s14, %s2274_s12 }
  0xb7   :  { %p2281_p8 = por %p2280_p12, %p2279_p7 }
  0xb9   :  { %p2282_p9 = pnand %p2281_p8, %p2275_p6 }
  0xbb   :  { %2285 = shalt.err (!%p2282_p9)  }
  0xbc   :  { %178 = dma.hbm_to_vmem [thread:$0]  %s165_s18, 16, %s176_s27, [#allocation3 + $0x3] }
  0xbd   :  { %s2696_s16 = sld [smem:[#allocation4 + $0x5]]  ;;  %s2489_s19 = smov [#allocation2 + $0x4]  }
  0xbe   :  { %s195_s21 = sshll.u32 %s2489_s19, 4  ;;  %p180_p10 = scmp.gt.s32.totalorder %s2685_s28, 0  ;;  %s196_s21 = int_to_ptr.vmem [resolvable:$true] %s195_s21 }
  0xbf   :  { %p1619_p11 = scmp.lt.s32.totalorder %s2685_s28, 255  ;;  %s2700_s15 = sld [smem:[#allocation4 + $0x6]] }
  0xc0   :  { %s2860_s28 = smov (!%p180_p10, %s2685_s28), 0  ;;  %s2490_s22 = smov [#allocation2 + $0x5]  }
  0xc1   :  { %s215_s24 = sshll.u32 %s2490_s22, 4  ;;  %s2862_s28 = smov (!%p1619_p11, %s2860_s28), 255  ;;  %s216_s24 = int_to_ptr.vmem [resolvable:$true] %s215_s24 }
  0xc2   :  { %s1624_s25 = sshll.u32 %s2862_s28, 4 }
  0xc3   :  { %p200_p0 = scmp.gt.s32.totalorder %s2696_s16, 0  ;;  %s185_s2 = scalar_lea.hbm %s2836_s1, %s1624_s25 }
  0xc4   :  { %s2286_s27 = scalar_lea.hbm %s185_s2, 16  ;;  %p2289_p5 = scmp.lt.u32.totalorder %s185_s2, %s2836_s1 }
  0xc5   :  { %p220_p3 = scmp.gt.s32.totalorder %s2700_s15, 0  ;;  %p2287_p4 = scmp.ne.s32.totalorder %s185_s2, %s2286_s27 }
  0xc6   :  { %p2290_p1 = scmp.lt.u32.totalorder %s2636_s23, %s2286_s27  ;;  %p2292_p6 = scmp.lt.u32.totalorder %s2286_s27, %s185_s2 }
  0xc8   :  { %p2291_p13 = por %p2290_p1, %p2289_p5 }
  0xca   :  { %p2293_p7 = por %p2292_p6, %p2291_p13 }
  0xcc   :  { %p2294_p12 = pnand %p2293_p7, %p2287_p4 }
  0xce   :  { %2297 = shalt.err (!%p2294_p12)  }
  0xcf   :  { %s2298_s6 = scalar_lea.vmem %s196_s21, 16  ;;  %p2303_p9 = scmp.lt.s32.totalorder %s196_s21, %s2619_s29 }
  0xd0   :  { %p2299_p8 = scmp.ne.s32.totalorder %s196_s21, %s2298_s6  ;;  %p2304_p10 = scmp.lt.s32.totalorder %s2645_s14, %s2298_s6 }
  0xd2   :  { %p2305_p11 = por %p2304_p10, %p2303_p9 }
  0xd4   :  { %p2306_p2 = pnand %p2305_p11, %p2299_p8 }
  0xd6   :  { %2309 = shalt.err (!%p2306_p2)  }
  0xd7   :  { %198 = dma.hbm_to_vmem [thread:$0]  %s185_s2, 16, %s196_s21, [#allocation3 + $0x4] }
  0xd8   :  { %s201_s28 = scalar_select %p200_p0, %s2696_s16, 0 }
  0xd9   :  { %s221_s18 = scalar_select %p220_p3, %s2700_s15, 0 }
  0xda   :  { %p2846_p4 = scmp.lt.s32.totalorder %s2696_s16, 255  ;;  %p1633_p5 = scmp.lt.s32.totalorder %s2700_s15, 255 }
  0xdb   :  { %s2724_s17 = sld [smem:[#allocation4 + $0x7]]  ;;  %s2491_s21 = smov [#allocation2 + $0x6]  }
  0xdc   :  { %s2864_s28 = smov (!%p2846_p4, %s201_s28), 255  ;;  %s235_s22 = sshll.u32 %s2491_s21, 4  ;;  %s236_s22 = int_to_ptr.vmem [resolvable:$true] %s235_s22 }
  0xdd   :  { %s1631_s3 = sshll.u32 %s2864_s28, 4 }
  0xde   :  { %s205_s19 = scalar_lea.hbm %s2836_s1, %s1631_s3 }
  0xdf   :  { %s2310_s25 = scalar_lea.hbm %s205_s19, 16  ;;  %p2313_p0 = scmp.lt.u32.totalorder %s205_s19, %s2836_s1 }
  0xe0   :  { %p2311_p2 = scmp.ne.s32.totalorder %s205_s19, %s2310_s25  ;;  %p2314_p3 = scmp.lt.u32.totalorder %s2636_s23, %s2310_s25 }
  0xe1   :  { %p2316_p13 = scmp.lt.u32.totalorder %s2310_s25, %s205_s19 }
  0xe2   :  { %p2315_p1 = por %p2314_p3, %p2313_p0 }
  0xe4   :  { %p2317_p6 = por %p2316_p13, %p2315_p1 }
  0xe6   :  { %p2318_p7 = pnand %p2317_p6, %p2311_p2 }
  0xe8   :  { %2321 = shalt.err (!%p2318_p7)  }
  0xe9   :  { %s2322_s16 = scalar_lea.vmem %s216_s24, 16  ;;  %p2327_p8 = scmp.lt.s32.totalorder %s216_s24, %s2619_s29 }
  0xea   :  { %p2323_p12 = scmp.ne.s32.totalorder %s216_s24, %s2322_s16  ;;  %p2328_p9 = scmp.lt.s32.totalorder %s2645_s14, %s2322_s16 }
  0xec   :  { %p2329_p10 = por %p2328_p9, %p2327_p8 }
  0xee   :  { %p2330_p11 = pnand %p2329_p10, %p2323_p12 }
  0xf0   :  { %2333 = shalt.err (!%p2330_p11)  }
  0xf1   :  { %218 = dma.hbm_to_vmem [thread:$0]  %s205_s19, 16, %s216_s24, [#allocation3 + $0x5] }
  0xf2   :  { %s2866_s18 = smov (!%p1633_p5, %s221_s18), 255  ;;  %p240_p4 = scmp.gt.s32.totalorder %s2724_s17, 0 }
  0xf3   :  { %s1638_s2 = sshll.u32 %s2866_s18, 4 }
  0xf4   :  { %s225_s11 = scalar_lea.hbm %s2836_s1, %s1638_s2 }
  0xf5   :  { %s2334_s6 = scalar_lea.hbm %s225_s11, 16  ;;  %p2337_p0 = scmp.lt.u32.totalorder %s225_s11, %s2836_s1 }
  0xf6   :  { %p2335_p2 = scmp.ne.s32.totalorder %s225_s11, %s2334_s6  ;;  %p2338_p3 = scmp.lt.u32.totalorder %s2636_s23, %s2334_s6 }
  0xf7   :  { %p2340_p13 = scmp.lt.u32.totalorder %s2334_s6, %s225_s11 }
  0xf8   :  { %p2339_p1 = por %p2338_p3, %p2337_p0 }
  0xfa   :  { %p2341_p6 = por %p2340_p13, %p2339_p1 }
  0xfc   :  { %p2342_p7 = pnand %p2341_p6, %p2335_p2 }
  0xfe   :  { %2345 = shalt.err (!%p2342_p7)  }
  0xff   :  { %s2346_s15 = scalar_lea.vmem %s236_s22, 16  ;;  %p2351_p12 = scmp.lt.s32.totalorder %s236_s22, %s2619_s29 }
 0x100   :  { %p2347_p5 = scmp.ne.s32.totalorder %s236_s22, %s2346_s15  ;;  %p2352_p8 = scmp.lt.s32.totalorder %s2645_s14, %s2346_s15 }
 0x102   :  { %p2353_p9 = por %p2352_p8, %p2351_p12 }
 0x104   :  { %p2354_p10 = pnand %p2353_p9, %p2347_p5 }
 0x106   :  { %2357 = shalt.err (!%p2354_p10)  }
 0x107   :  { %238 = dma.hbm_to_vmem [thread:$0]  %s225_s11, 16, %s236_s22, [#allocation3 + $0x6] }
 0x108   :  { %s241_s24 = scalar_select %p240_p4, %s2724_s17, 0 }
 0x109   :  { %p1640_p11 = scmp.lt.s32.totalorder %s2724_s17, 255  ;;  %s2492_s18 = smov [#allocation2 + $0x7]  }
 0x10a   :  { %s255_s20 = sshll.u32 %s2492_s18, 4  ;;  %s256_s20 = int_to_ptr.vmem [resolvable:$true] %s255_s20 }
 0x10b   :  { %s2868_s24 = smov (!%p1640_p11, %s241_s24), 255 }
 0x10c   :  { %s1645_s12 = sshll.u32 %s2868_s24, 4 }
 0x10d   :  { %s245_s25 = scalar_lea.hbm %s2836_s1, %s1645_s12 }
 0x10e   :  { %s2358_s4 = scalar_lea.hbm %s245_s25, 16  ;;  %p2361_p0 = scmp.lt.u32.totalorder %s245_s25, %s2836_s1 }
 0x10f   :  { %p2359_p2 = scmp.ne.s32.totalorder %s245_s25, %s2358_s4  ;;  %p2362_p3 = scmp.lt.u32.totalorder %s2636_s23, %s2358_s4 }
 0x110   :  { %p2364_p13 = scmp.lt.u32.totalorder %s2358_s4, %s245_s25 }
 0x111   :  { %p2363_p1 = por %p2362_p3, %p2361_p0 }
 0x113   :  { %p2365_p4 = por %p2364_p13, %p2363_p1 }
 0x115   :  { %p2366_p6 = pnand %p2365_p4, %p2359_p2 }
 0x117   :  { %2369 = shalt.err (!%p2366_p6)  }
 0x118   :  { %s2370_s17 = scalar_lea.vmem %s256_s20, 16  ;;  %p2375_p5 = scmp.lt.s32.totalorder %s256_s20, %s2619_s29 }
 0x119   :  { %p2371_p7 = scmp.ne.s32.totalorder %s256_s20, %s2370_s17  ;;  %p2376_p12 = scmp.lt.s32.totalorder %s2645_s14, %s2370_s17 }
 0x11b   :  { %p2377_p8 = por %p2376_p12, %p2375_p5 }
 0x11d   :  { %p2378_p9 = pnand %p2377_p8, %p2371_p7 }
 0x11f   :  { %2381 = shalt.err (!%p2378_p9)  }
 0x120   :  { %258 = dma.hbm_to_vmem [thread:$0]  %s245_s25, 16, %s256_s20, [#allocation3 + $0x7] }
 0x121   :  { %2456 = dma.done.wait [#allocation3], 16 }
 0x122   :  { %2457 = vsyncadd [#allocation3], 4294967280 }
 0x123   :  { %2458 = dma.done.wait [#allocation3 + $0x1], 16 }
 0x124   :  { %2459 = vsyncadd [#allocation3 + $0x1], 4294967280 }
 0x125   :  { %2460 = dma.done.wait [#allocation3 + $0x2], 16 }
 0x126   :  { %2461 = vsyncadd [#allocation3 + $0x2], 4294967280 }
 0x127   :  { %2462 = dma.done.wait [#allocation3 + $0x3], 16 }
 0x128   :  { %2463 = vsyncadd [#allocation3 + $0x3], 4294967280 }
 0x129   :  { %2464 = dma.done.wait [#allocation3 + $0x4], 16 }
 0x12a   :  { %2465 = vsyncadd [#allocation3 + $0x4], 4294967280 }
 0x12b   :  { %2466 = dma.done.wait [#allocation3 + $0x5], 16 }
 0x12c   :  { %2467 = vsyncadd [#allocation3 + $0x5], 4294967280 }
 0x12d   :  { %2468 = dma.done.wait [#allocation3 + $0x6], 16 }
 0x12e   :  { %2469 = vsyncadd [#allocation3 + $0x6], 4294967280 }
 0x12f   :  { %2470 = dma.done.wait [#allocation3 + $0x7], 16 }
 0x130   :  { %2471 = vsyncadd [#allocation3 + $0x7], 4294967280  ;;  %v1842_v0 = vld [vmem:[#allocation11 + $0x4] ss:$16 sps:$4 sm:$0xff]   ;;  %v1844_v1 = vld [vmem:[#allocation11] ss:$16 sps:$4 sm:$0xff]  }
 0x131   :  { %687 = vmatprep.subr.bf16.mxu0 %v1842_v0  ;;  %v1845_v2 = vld [vmem:[#allocation11 + $0x24] ss:$16 sps:$4 sm:$0xff]   ;;  %v1847_v3 = vld [vmem:[#allocation11 + $0x20] ss:$16 sps:$4 sm:$0xff]   ;;  %v1853_v5 = vld [vmem:[#allocation11 + $0xc] ss:$16 sps:$4 sm:$0xff]  }
 0x132   :  { %688 = vmatpush1.bf16.msra.mxu0 %v1844_v1  ;;  %v1848_v4 = vld [vmem:[#allocation11 + $0x44] ss:$16 sps:$4 sm:$0xff]   ;;  %v1856_v6 = vld [vmem:[#allocation11 + $0x8] ss:$16 sps:$4 sm:$0xff]   ;;  %v1850_v7 = vld [vmem:[#allocation11 + $0x40] ss:$16 sps:$4 sm:$0xff]   ;;  %728 = vmatprep.subr.bf16.mxu1 %v1853_v5 }
 0x133   :  { %689 = vmatprep.subr.bf16.mxu0 %v1845_v2  ;;  %v1851_v8 = vld [vmem:[#allocation11 + $0x64] ss:$16 sps:$4 sm:$0xff]   ;;  %729 = vmatpush1.bf16.msra.mxu1 %v1856_v6  ;;  %v1859_v9 = vld [vmem:[#allocation11 + $0x2c] ss:$16 sps:$4 sm:$0xff]   ;;  %v1862_v10 = vld [vmem:[#allocation11 + $0x28] ss:$16 sps:$4 sm:$0xff]  }
 0x134   :  { %730 = vmatprep.subr.bf16.mxu1 %v1859_v9  ;;  %v1855_v11 = vld [vmem:[#allocation11 + $0x60] ss:$16 sps:$4 sm:$0xff]   ;;  %v1857_v12 = vld [vmem:[#allocation11 + $0x84] ss:$16 sps:$4 sm:$0xff]   ;;  %v1865_v13 = vld [vmem:[#allocation11 + $0x4c] ss:$16 sps:$4 sm:$0xff]  }
 0x135   :  { %v1868_v14 = vld [vmem:[#allocation11 + $0x48] ss:$16 sps:$4 sm:$0xff]   ;;  %v1871_v15 = vld [vmem:[#allocation11 + $0x6c] ss:$16 sps:$4 sm:$0xff]   ;;  %v1861_v16 = vld [vmem:[#allocation11 + $0x80] ss:$16 sps:$4 sm:$0xff]  }
 0x136   :  { %690 = vmatpush1.bf16.msra.mxu0 %v1847_v3  ;;  %v1863_v17 = vld [vmem:[#allocation11 + $0xa4] ss:$16 sps:$4 sm:$0xff]   ;;  %v1874_v18 = vld [vmem:[#allocation11 + $0x68] ss:$16 sps:$4 sm:$0xff]   ;;  %v1877_v19 = vld [vmem:[#allocation11 + $0x8c] ss:$16 sps:$4 sm:$0xff]  }
 0x137   :  { %691 = vmatprep.subr.bf16.mxu0 %v1848_v4  ;;  %731 = vmatpush1.bf16.msra.mxu1 %v1862_v10  ;;  %v1867_v20 = vld [vmem:[#allocation11 + $0xa0] ss:$16 sps:$4 sm:$0xff]   ;;  %v1869_v21 = vld [vmem:[#allocation11 + $0xc4] ss:$16 sps:$4 sm:$0xff]   ;;  %v1880_v22 = vld [vmem:[#allocation11 + $0x88] ss:$16 sps:$4 sm:$0xff]  }
 0x138   :  { %732 = vmatprep.subr.bf16.mxu1 %v1865_v13  ;;  %v1883_v23 = vld [vmem:[#allocation11 + $0xac] ss:$16 sps:$4 sm:$0xff]   ;;  %v1873_v24 = vld [vmem:[#allocation11 + $0xc0] ss:$16 sps:$4 sm:$0xff]   ;;  %v1875_v25 = vld [vmem:[#allocation11 + $0xe4] ss:$16 sps:$4 sm:$0xff]  }
 0x139   :  { %v1886_v26 = vld [vmem:[#allocation11 + $0xa8] ss:$16 sps:$4 sm:$0xff]   ;;  %v1889_v27 = vld [vmem:[#allocation11 + $0xcc] ss:$16 sps:$4 sm:$0xff]   ;;  %v1879_v28 = vld [vmem:[#allocation11 + $0xe0] ss:$16 sps:$4 sm:$0xff]  }
 0x13a   :  { %692 = vmatpush1.bf16.msra.mxu0 %v1850_v7  ;;  %v1881_v29 = vld [vmem:[#allocation11 + $0x104] ss:$16 sps:$4 sm:$0xff]   ;;  %v1892_v30 = vld [vmem:[#allocation11 + $0xc8] ss:$16 sps:$4 sm:$0xff]   ;;  %v1895_v31 = vld [vmem:[#allocation11 + $0xec] ss:$16 sps:$4 sm:$0xff]  }
 0x13b   :  { %693 = vmatprep.subr.bf16.mxu0 %v1851_v8  ;;  %733 = vmatpush1.bf16.msra.mxu1 %v1868_v14  ;;  %v1885_v32 = vld [vmem:[#allocation11 + $0x100] ss:$16 sps:$4 sm:$0xff]   ;;  %v1887_v33 = vld [vmem:[#allocation11 + $0x124] ss:$16 sps:$4 sm:$0xff]   ;;  %v1898_v34 = vld [vmem:[#allocation11 + $0xe8] ss:$16 sps:$4 sm:$0xff]  }
 0x13c   :  { %734 = vmatprep.subr.bf16.mxu1 %v1871_v15  ;;  %v1901_v35 = vld [vmem:[#allocation11 + $0x10c] ss:$16 sps:$4 sm:$0xff]   ;;  %v1891_v36 = vld [vmem:[#allocation11 + $0x120] ss:$16 sps:$4 sm:$0xff]   ;;  %v1893_v37 = vld [vmem:[#allocation11 + $0x144] ss:$16 sps:$4 sm:$0xff]  }
 0x13d   :  { %v1904_v38 = vld [vmem:[#allocation11 + $0x108] ss:$16 sps:$4 sm:$0xff]   ;;  %v1907_v39 = vld [vmem:[#allocation11 + $0x12c] ss:$16 sps:$4 sm:$0xff]   ;;  %v277_v40 = vld [vmem:[#allocation8] sm:$0xff] }
 0x13e   :  { %694 = vmatpush1.bf16.msra.mxu0 %v1855_v11  ;;  %v1897_v41 = vld [vmem:[#allocation11 + $0x140] ss:$16 sps:$4 sm:$0xff]   ;;  %v280_v42 = vpack.c.bf16 %v277_v40, %v277_v40  ;;  %v1899_v43 = vld [vmem:[#allocation11 + $0x164] ss:$16 sps:$4 sm:$0xff]   ;;  %v1910_v44 = vld [vmem:[#allocation11 + $0x128] ss:$16 sps:$4 sm:$0xff]  }
 0x13f   :  { %695 = vmatprep.subr.bf16.mxu0 %v1857_v12  ;;  %735 = vmatpush1.bf16.msra.mxu1 %v1874_v18  ;;  %v1913_v45 = vld [vmem:[#allocation11 + $0x14c] ss:$16 sps:$4 sm:$0xff]   ;;  %v1903_v46 = vld [vmem:[#allocation11 + $0x160] ss:$16 sps:$4 sm:$0xff]   ;;  %v1905_v47 = vld [vmem:[#allocation11 + $0x184] ss:$16 sps:$4 sm:$0xff]  }
 0x140   :  { %736 = vmatprep.subr.bf16.mxu1 %v1877_v19  ;;  %719 = vmatprep.mubr.bf16.mxu0 %v280_v42  ;;  %v1916_v48 = vld [vmem:[#allocation11 + $0x148] ss:$16 sps:$4 sm:$0xff]   ;;  %v1919_v49 = vld [vmem:[#allocation11 + $0x16c] ss:$16 sps:$4 sm:$0xff]   ;;  %v1909_v50 = vld [vmem:[#allocation11 + $0x180] ss:$16 sps:$4 sm:$0xff]  }
 0x141   :  { %760 = vmatprep.mubr.bf16.mxu1 %v280_v42  ;;  %v1911_v51 = vld [vmem:[#allocation11 + $0x1a4] ss:$16 sps:$4 sm:$0xff]   ;;  %v1922_v52 = vld [vmem:[#allocation11 + $0x168] ss:$16 sps:$4 sm:$0xff]   ;;  %v1925_v53 = vld [vmem:[#allocation11 + $0x18c] ss:$16 sps:$4 sm:$0xff]  }
 0x142   :  { %696 = vmatpush1.bf16.msra.mxu0 %v1861_v16  ;;  %v1915_v54 = vld [vmem:[#allocation11 + $0x1a0] ss:$16 sps:$4 sm:$0xff]   ;;  %v1917_v55 = vld [vmem:[#allocation11 + $0x1c4] ss:$16 sps:$4 sm:$0xff]   ;;  %v1928_v56 = vld [vmem:[#allocation11 + $0x188] ss:$16 sps:$4 sm:$0xff]  }
 0x143   :  { %697 = vmatprep.subr.bf16.mxu0 %v1863_v17  ;;  %737 = vmatpush1.bf16.msra.mxu1 %v1880_v22  ;;  %v1921_v57 = vld [vmem:[#allocation11 + $0x1c0] ss:$16 sps:$4 sm:$0xff]   ;;  %v1929_v58 = vld [vmem:[#allocation11 + $0x1ac] ss:$16 sps:$4 sm:$0xff]   ;;  %v1923_v59 = vld [vmem:[#allocation11 + $0x1e4] ss:$16 sps:$4 sm:$0xff]  }
 0x144   :  { %738 = vmatprep.subr.bf16.mxu1 %v1883_v23  ;;  %v1931_v60 = vld [vmem:[#allocation11 + $0x1a8] ss:$16 sps:$4 sm:$0xff]   ;;  %v1932_v61 = vld [vmem:[#allocation11 + $0x1cc] ss:$16 sps:$4 sm:$0xff]   ;;  %v1927_v62 = vld [vmem:[#allocation11 + $0x1e0] ss:$16 sps:$4 sm:$0xff]  }
 0x145   :  { %v276_v63 = vld [vmem:[#allocation2] sm:$0xff]  ;;  %v1940_v1 = vld [vmem:[#allocation11 + $0x204] ss:$16 sps:$4 sm:$0xff]   ;;  %v1938_v3 = vld [vmem:[#allocation11 + $0x200] ss:$16 sps:$4 sm:$0xff]  }
 0x146   :  { %698 = vmatpush1.bf16.msra.mxu0 %v1867_v20  ;;  %v1934_v0 = vld [vmem:[#allocation11 + $0x1c8] ss:$16 sps:$4 sm:$0xff]   ;;  %v1935_v2 = vld [vmem:[#allocation11 + $0x1ec] ss:$16 sps:$4 sm:$0xff]   ;;  %v279_v4 = vpack.c.bf16 %v276_v63, %v276_v63  ;;  %v1946_v6 = vld [vmem:[#allocation11 + $0x224] ss:$16 sps:$4 sm:$0xff]  }
 0x147   :  { %699 = vmatprep.subr.bf16.mxu0 %v1869_v21  ;;  %739 = vmatpush1.bf16.msra.mxu1 %v1886_v26  ;;  %v1937_v5 = vld [vmem:[#allocation11 + $0x1e8] ss:$16 sps:$4 sm:$0xff]   ;;  %v1943_v7 = vld [vmem:[#allocation11 + $0x20c] ss:$16 sps:$4 sm:$0xff]   ;;  %v1944_v8 = vld [vmem:[#allocation11 + $0x220] ss:$16 sps:$4 sm:$0xff]  }
 0x148   :  { %740 = vmatprep.subr.bf16.mxu1 %v1889_v27  ;;  %v1941_v9 = vld [vmem:[#allocation11 + $0x208] ss:$16 sps:$4 sm:$0xff]   ;;  %v1952_v10 = vld [vmem:[#allocation11 + $0x244] ss:$16 sps:$4 sm:$0xff]   ;;  %v1949_v11 = vld [vmem:[#allocation11 + $0x22c] ss:$16 sps:$4 sm:$0xff]  }
 0x149   :  { %v1950_v12 = vld [vmem:[#allocation11 + $0x240] ss:$16 sps:$4 sm:$0xff]   ;;  %v1947_v13 = vld [vmem:[#allocation11 + $0x228] ss:$16 sps:$4 sm:$0xff]   ;;  %v1958_v14 = vld [vmem:[#allocation11 + $0x264] ss:$16 sps:$4 sm:$0xff]  }
 0x14a   :  { %700 = vmatpush1.bf16.msra.mxu0 %v1873_v24  ;;  %v1955_v15 = vld [vmem:[#allocation11 + $0x24c] ss:$16 sps:$4 sm:$0xff]   ;;  %v1956_v16 = vld [vmem:[#allocation11 + $0x260] ss:$16 sps:$4 sm:$0xff]   ;;  %v1953_v17 = vld [vmem:[#allocation11 + $0x248] ss:$16 sps:$4 sm:$0xff]  }
 0x14b   :  { %701 = vmatprep.subr.bf16.mxu0 %v1875_v25  ;;  %741 = vmatpush1.bf16.msra.mxu1 %v1892_v30  ;;  %v1961_v18 = vld [vmem:[#allocation11 + $0x26c] ss:$16 sps:$4 sm:$0xff]   ;;  %v1959_v19 = vld [vmem:[#allocation11 + $0x268] ss:$16 sps:$4 sm:$0xff]   ;;  %v1964_v20 = vld [vmem:[#allocation11 + $0x284] ss:$16 sps:$4 sm:$0xff]  }
 0x14c   :  { %742 = vmatprep.subr.bf16.mxu1 %v1895_v31  ;;  %v1967_v21 = vld [vmem:[#allocation11 + $0x28c] ss:$16 sps:$4 sm:$0xff]   ;;  %v1962_v22 = vld [vmem:[#allocation11 + $0x280] ss:$16 sps:$4 sm:$0xff]   ;;  %v1965_v23 = vld [vmem:[#allocation11 + $0x288] ss:$16 sps:$4 sm:$0xff]  }
 0x14d   :  { %v1970_v24 = vld [vmem:[#allocation11 + $0x2a4] ss:$16 sps:$4 sm:$0xff]   ;;  %v1973_v25 = vld [vmem:[#allocation11 + $0x2ac] ss:$16 sps:$4 sm:$0xff]   ;;  %v1968_v26 = vld [vmem:[#allocation11 + $0x2a0] ss:$16 sps:$4 sm:$0xff]  }
 0x14e   :  { %702 = vmatpush1.bf16.msra.mxu0 %v1879_v28  ;;  %v1971_v27 = vld [vmem:[#allocation11 + $0x2a8] ss:$16 sps:$4 sm:$0xff]   ;;  %v1976_v28 = vld [vmem:[#allocation11 + $0x2c4] ss:$16 sps:$4 sm:$0xff]   ;;  %v1974_v30 = vld [vmem:[#allocation11 + $0x2c0] ss:$16 sps:$4 sm:$0xff]  }
 0x14f   :  { %703 = vmatprep.subr.bf16.mxu0 %v1881_v29  ;;  %743 = vmatpush1.bf16.msra.mxu1 %v1898_v34  ;;  %v1979_v29 = vld [vmem:[#allocation11 + $0x2cc] ss:$16 sps:$4 sm:$0xff]   ;;  %v1977_v31 = vld [vmem:[#allocation11 + $0x2c8] ss:$16 sps:$4 sm:$0xff]   ;;  %v1980_v34 = vld [vmem:[#allocation11 + $0x2e0] ss:$16 sps:$4 sm:$0xff]  }
 0x150   :  { %744 = vmatprep.subr.bf16.mxu1 %v1901_v35  ;;  %v1983_v35 = vld [vmem:[#allocation11 + $0x2e8] ss:$16 sps:$4 sm:$0xff]   ;;  %v1994_v40 = vld [vmem:[#allocation11 + $0x324] ss:$16 sps:$4 sm:$0xff]   ;;  %v1992_v42 = vld [vmem:[#allocation11 + $0x320] ss:$16 sps:$4 sm:$0xff]  }
 0x151   :  { %v2025_v63 = vld [vmem:[#allocation11 + $0x3c8] ss:$16 sps:$4 sm:$0xff]  }
 0x152   :  { %704 = vmatpush1.bf16.msra.mxu0 %v1885_v32  ;;  %v1982_v32 = vld [vmem:[#allocation11 + $0x2e4] ss:$16 sps:$4 sm:$0xff]  }
 0x153   :  { %705 = vmatprep.subr.bf16.mxu0 %v1887_v33  ;;  %745 = vmatpush1.bf16.msra.mxu1 %v1904_v38  ;;  %v1985_v33 = vld [vmem:[#allocation11 + $0x2ec] ss:$16 sps:$4 sm:$0xff]   ;;  %v1986_v38 = vld [vmem:[#allocation11 + $0x300] ss:$16 sps:$4 sm:$0xff]  }
 0x154   :  { %746 = vmatprep.subr.bf16.mxu1 %v1907_v39  ;;  %v1989_v39 = vld [vmem:[#allocation11 + $0x308] ss:$16 sps:$4 sm:$0xff]  }
 0x156   :  { %706 = vmatpush1.bf16.msra.mxu0 %v1891_v36  ;;  %v1988_v36 = vld [vmem:[#allocation11 + $0x304] ss:$16 sps:$4 sm:$0xff]  }
 0x157   :  { %707 = vmatprep.subr.bf16.mxu0 %v1893_v37  ;;  %747 = vmatpush1.bf16.msra.mxu1 %v1910_v44  ;;  %v1991_v37 = vld [vmem:[#allocation11 + $0x30c] ss:$16 sps:$4 sm:$0xff]   ;;  %v2000_v44 = vld [vmem:[#allocation11 + $0x344] ss:$16 sps:$4 sm:$0xff]  }
 0x158   :  { %748 = vmatprep.subr.bf16.mxu1 %v1913_v45  ;;  %v2003_v45 = vld [vmem:[#allocation11 + $0x34c] ss:$16 sps:$4 sm:$0xff]  }
 0x15a   :  { %708 = vmatpush1.bf16.msra.mxu0 %v1897_v41  ;;  %v1997_v41 = vld [vmem:[#allocation11 + $0x32c] ss:$16 sps:$4 sm:$0xff]  }
 0x15b   :  { %709 = vmatprep.subr.bf16.mxu0 %v1899_v43  ;;  %749 = vmatpush1.bf16.msra.mxu1 %v1916_v48  ;;  %v1995_v43 = vld [vmem:[#allocation11 + $0x328] ss:$16 sps:$4 sm:$0xff]   ;;  %v2006_v48 = vld [vmem:[#allocation11 + $0x364] ss:$16 sps:$4 sm:$0xff]  }
 0x15c   :  { %750 = vmatprep.subr.bf16.mxu1 %v1919_v49  ;;  %v2009_v49 = vld [vmem:[#allocation11 + $0x36c] ss:$16 sps:$4 sm:$0xff]  }
 0x15e   :  { %710 = vmatpush1.bf16.msra.mxu0 %v1903_v46  ;;  %v1998_v46 = vld [vmem:[#allocation11 + $0x340] ss:$16 sps:$4 sm:$0xff]  }
 0x15f   :  { %711 = vmatprep.subr.bf16.mxu0 %v1905_v47  ;;  %751 = vmatpush1.bf16.msra.mxu1 %v1922_v52  ;;  %v2001_v47 = vld [vmem:[#allocation11 + $0x348] ss:$16 sps:$4 sm:$0xff]   ;;  %v2012_v52 = vld [vmem:[#allocation11 + $0x384] ss:$16 sps:$4 sm:$0xff]  }
 0x160   :  { %752 = vmatprep.subr.bf16.mxu1 %v1925_v53  ;;  %v2015_v53 = vld [vmem:[#allocation11 + $0x38c] ss:$16 sps:$4 sm:$0xff]  }
 0x162   :  { %712 = vmatpush1.bf16.msra.mxu0 %v1909_v50  ;;  %v2004_v50 = vld [vmem:[#allocation11 + $0x360] ss:$16 sps:$4 sm:$0xff]  }
 0x163   :  { %713 = vmatprep.subr.bf16.mxu0 %v1911_v51  ;;  %753 = vmatpush1.bf16.msra.mxu1 %v1928_v56  ;;  %v2007_v51 = vld [vmem:[#allocation11 + $0x368] ss:$16 sps:$4 sm:$0xff]   ;;  %v2016_v56 = vld [vmem:[#allocation11 + $0x3a0] ss:$16 sps:$4 sm:$0xff]  }
 0x164   :  { %754 = vmatprep.subr.bf16.mxu1 %v1929_v58  ;;  %v2019_v58 = vld [vmem:[#allocation11 + $0x3a8] ss:$16 sps:$4 sm:$0xff]  }
 0x166   :  { %714 = vmatpush1.bf16.msra.mxu0 %v1915_v54  ;;  %v2010_v54 = vld [vmem:[#allocation11 + $0x380] ss:$16 sps:$4 sm:$0xff]  }
 0x167   :  { %715 = vmatprep.subr.bf16.mxu0 %v1917_v55  ;;  %755 = vmatpush1.bf16.msra.mxu1 %v1931_v60  ;;  %v2013_v55 = vld [vmem:[#allocation11 + $0x388] ss:$16 sps:$4 sm:$0xff]   ;;  %v2024_v60 = vld [vmem:[#allocation11 + $0x3c4] ss:$16 sps:$4 sm:$0xff]  }
 0x168   :  { %756 = vmatprep.subr.bf16.mxu1 %v1932_v61  ;;  %v2027_v61 = vld [vmem:[#allocation11 + $0x3cc] ss:$16 sps:$4 sm:$0xff]  }
 0x16a   :  { %716 = vmatpush1.bf16.msra.mxu0 %v1921_v57  ;;  %v2018_v57 = vld [vmem:[#allocation11 + $0x3a4] ss:$16 sps:$4 sm:$0xff]  }
 0x16b   :  { %717 = vmatprep.subr.bf16.mxu0 %v1923_v59  ;;  %757 = vmatpush1.bf16.msra.mxu1 %v1934_v0  ;;  %v2021_v59 = vld [vmem:[#allocation11 + $0x3ac] ss:$16 sps:$4 sm:$0xff]  }
 0x16c   :  { %758 = vmatprep.subr.bf16.mxu1 %v1935_v2  ;;  %v796_v0 = vld [vmem:[#allocation8 + $0x8] sm:$0xff] }
 0x16d   :  { %v2033_v2 = vld [vmem:[#allocation11 + $0x3ec] ss:$16 sps:$4 sm:$0xff]  }
 0x16e   :  { %718 = vmatpush1.bf16.msra.mxu0 %v1927_v62  ;;  %v2022_v62 = vld [vmem:[#allocation11 + $0x3c0] ss:$16 sps:$4 sm:$0xff]  }
 0x16f   :  { %1209 = vmatprep.subr.bf16.mxu0 %v1940_v1  ;;  %759 = vmatpush1.bf16.msra.mxu1 %v1937_v5  ;;  %v2030_v1 = vld [vmem:[#allocation11 + $0x3e4] ss:$16 sps:$4 sm:$0xff]   ;;  %v2031_v5 = vld [vmem:[#allocation11 + $0x3e8] ss:$16 sps:$4 sm:$0xff]  }
 0x170   :  { %1250 = vmatprep.subr.bf16.mxu1 %v1943_v7 }
 0x171   :  { %720 = vmatmul.mubr.bf16.vlgmr.msra.gmra.mrb[0].mxu0 %v279_v4 }
 0x172   :  { %1210 = vmatpush1.bf16.msra.mxu0 %v1938_v3  ;;  %761 = vmatmul.mubr.bf16.vlgmr.msra.gmra.mrb[0].mxu1 %v279_v4  ;;  %v800_v3 = vpack.c.bf16 %v796_v0, %v796_v0  ;;  %v2028_v4 = vld [vmem:[#allocation11 + $0x3e0] ss:$16 sps:$4 sm:$0xff]   ;;  %v2057_v0 = vld [vmem:[#allocation12 + $0x74] ss:$8 sps:$4 sm:$0xff]  }
 0x173   :  { %1211 = vmatprep.subr.bf16.mxu0 %v1946_v6  ;;  %1251 = vmatpush1.bf16.msra.mxu1 %v1941_v9  ;;  %v347_v6 = vlaneseq  ;;  %v345_v9 = vld [vmem:[%s2840_s5] sm:$0xf] }
 0x174   :  { %1252 = vmatprep.subr.bf16.mxu1 %v1949_v11  ;;  %1241 = vmatprep.mubr.bf16.mxu0 %v800_v3 }
 0x175   :  { %1282 = vmatprep.mubr.bf16.mxu1 %v800_v3  ;;  %v2760_v7 = vshrl.u32 %v347_v6, 7 }
 0x176   :  { %1212 = vmatpush1.bf16.msra.mxu0 %v1944_v8 }
 0x177   :  { %1213 = vmatprep.subr.bf16.mxu0 %v1952_v10  ;;  %1253 = vmatpush1.bf16.msra.mxu1 %v1947_v13  ;;  %v2763_v8 = vsub.s32 0, %v2760_v7  ;;  %v2769_v10 = vsub.s32 1, %v2760_v7  ;;  %v361_v13 = vsub.s32 3, %v2760_v7 }
 0x178   :  { %1254 = vmatprep.subr.bf16.mxu1 %v1955_v15 }
 0x179   :  { %v350_v11 = vrot.slane %v345_v9, %v2763_v8 }
 0x17a   :  { %1214 = vmatpush1.bf16.msra.mxu0 %v1950_v12  ;;  %v354_v12 = vrot.slane %v345_v9, %v2769_v10 }
 0x17b   :  { %1215 = vmatprep.subr.bf16.mxu0 %v1958_v14  ;;  %1255 = vmatpush1.bf16.msra.mxu1 %v1953_v17 }
 0x17c   :  { %1256 = vmatprep.subr.bf16.mxu1 %v1961_v18 }
 0x17e   :  { %1216 = vmatpush1.bf16.msra.mxu0 %v1956_v16 }
 0x17f   :  { %1257 = vmatpush1.bf16.msra.mxu1 %v1959_v19  ;;  %1217 = vmatprep.subr.bf16.mxu0 %v1964_v20 }
 0x180   :  { %1258 = vmatprep.subr.bf16.mxu1 %v1967_v21  ;;  %v362_v21 = vrot.slane %v345_v9, %v361_v13 }
 0x182   :  { %1218 = vmatpush1.bf16.msra.mxu0 %v1962_v22 }
 0x183   :  { %1259 = vmatpush1.bf16.msra.mxu1 %v1965_v23  ;;  %1219 = vmatprep.subr.bf16.mxu0 %v1970_v24  ;;  %v357_v23 = vsub.s32 2, %v2760_v7 }
 0x184   :  { %1260 = vmatprep.subr.bf16.mxu1 %v1973_v25 }
 0x186   :  { %1220 = vmatpush1.bf16.msra.mxu0 %v1968_v26 }
 0x187   :  { %1261 = vmatpush1.bf16.msra.mxu1 %v1971_v27  ;;  %1221 = vmatprep.subr.bf16.mxu0 %v1976_v28  ;;  %v358_v28 = vrot.slane %v345_v9, %v357_v23 }
 0x188   :  { %1262 = vmatprep.subr.bf16.mxu1 %v1979_v29 }
 0x18a   :  { %1222 = vmatpush1.bf16.msra.mxu0 %v1974_v30 }
 0x18b   :  { %1263 = vmatpush1.bf16.msra.mxu1 %v1977_v31  ;;  %1223 = vmatprep.subr.bf16.mxu0 %v1982_v32 }
 0x18c   :  { %1264 = vmatprep.subr.bf16.mxu1 %v1985_v33 }
 0x18e   :  { %1224 = vmatpush1.bf16.msra.mxu0 %v1980_v34 }
 0x18f   :  { %1265 = vmatpush1.bf16.msra.mxu1 %v1983_v35  ;;  %1225 = vmatprep.subr.bf16.mxu0 %v1988_v36 }
 0x190   :  { %1266 = vmatprep.subr.bf16.mxu1 %v1991_v37 }
 0x192   :  { %1226 = vmatpush1.bf16.msra.mxu0 %v1986_v38  ;;  %v278_v38 = vld [vmem:[#allocation9] sm:$0xff] }
 0x193   :  { %1267 = vmatpush1.bf16.msra.mxu1 %v1989_v39  ;;  %1227 = vmatprep.subr.bf16.mxu0 %v1994_v40 }
 0x194   :  { %1268 = vmatprep.subr.bf16.mxu1 %v1997_v41 }
 0x196   :  { %1228 = vmatpush1.bf16.msra.mxu0 %v1992_v42 }
 0x197   :  { %1269 = vmatpush1.bf16.msra.mxu1 %v1995_v43  ;;  %1229 = vmatprep.subr.bf16.mxu0 %v2000_v44 }
 0x198   :  { %1270 = vmatprep.subr.bf16.mxu1 %v2003_v45 }
 0x19a   :  { %1230 = vmatpush1.bf16.msra.mxu0 %v1998_v46 }
 0x19b   :  { %1271 = vmatpush1.bf16.msra.mxu1 %v2001_v47  ;;  %1231 = vmatprep.subr.bf16.mxu0 %v2006_v48 }
 0x19c   :  { %1272 = vmatprep.subr.bf16.mxu1 %v2009_v49  ;;  %v2036_v49 = vld [vmem:[#allocation12 + $0x4] ss:$8 sps:$4 sm:$0xff]  }
 0x19e   :  { %1232 = vmatpush1.bf16.msra.mxu0 %v2004_v50  ;;  %v2034_v50 = vld [vmem:[#allocation12] ss:$8 sps:$4 sm:$0xff]  }
 0x19f   :  { %1273 = vmatpush1.bf16.msra.mxu1 %v2007_v51  ;;  %1233 = vmatprep.subr.bf16.mxu0 %v2012_v52  ;;  %v2039_v51 = vld [vmem:[#allocation12 + $0x14] ss:$8 sps:$4 sm:$0xff]   ;;  %v2037_v52 = vld [vmem:[#allocation12 + $0x10] ss:$8 sps:$4 sm:$0xff]  }
 0x1a0   :  { %1274 = vmatprep.subr.bf16.mxu1 %v2015_v53  ;;  %v2042_v53 = vld [vmem:[#allocation12 + $0x24] ss:$8 sps:$4 sm:$0xff]  }
 0x1a2   :  { %1234 = vmatpush1.bf16.msra.mxu0 %v2010_v54  ;;  %v2040_v54 = vld [vmem:[#allocation12 + $0x20] ss:$8 sps:$4 sm:$0xff]  }
 0x1a3   :  { %1275 = vmatpush1.bf16.msra.mxu1 %v2013_v55  ;;  %1235 = vmatprep.subr.bf16.mxu0 %v2018_v57  ;;  %v2045_v55 = vld [vmem:[#allocation12 + $0x34] ss:$8 sps:$4 sm:$0xff]   ;;  %v2048_v57 = vld [vmem:[#allocation12 + $0x44] ss:$8 sps:$4 sm:$0xff]  }
 0x1a4   :  { %1276 = vmatprep.subr.bf16.mxu1 %v2021_v59  ;;  %v2051_v59 = vld [vmem:[#allocation12 + $0x54] ss:$8 sps:$4 sm:$0xff]  }
 0x1a6   :  { %1236 = vmatpush1.bf16.msra.mxu0 %v2016_v56  ;;  %v2043_v56 = vld [vmem:[#allocation12 + $0x30] ss:$8 sps:$4 sm:$0xff]  }
 0x1a7   :  { %1277 = vmatpush1.bf16.msra.mxu1 %v2019_v58  ;;  %1237 = vmatprep.subr.bf16.mxu0 %v2024_v60  ;;  %v2046_v58 = vld [vmem:[#allocation12 + $0x40] ss:$8 sps:$4 sm:$0xff]   ;;  %v2049_v60 = vld [vmem:[#allocation12 + $0x50] ss:$8 sps:$4 sm:$0xff]  }
 0x1a8   :  { %1278 = vmatprep.subr.bf16.mxu1 %v2027_v61  ;;  %v2054_v61 = vld [vmem:[#allocation12 + $0x64] ss:$8 sps:$4 sm:$0xff]  }
 0x1aa   :  { %1238 = vmatpush1.bf16.msra.mxu0 %v2022_v62  ;;  %v2493_v62 = vmov 0  }
 0x1ab   :  { %1279 = vmatpush1.bf16.msra.mxu1 %v2025_v63  ;;  %1239 = vmatprep.subr.bf16.mxu0 %v2030_v1  ;;  %v2052_v63 = vld [vmem:[#allocation12 + $0x60] ss:$8 sps:$4 sm:$0xff]   ;;  %v2055_v1 = vld [vmem:[#allocation12 + $0x70] ss:$8 sps:$4 sm:$0xff]  }
 0x1ac   :  { %1280 = vmatprep.subr.bf16.mxu1 %v2033_v2  ;;  %v1713_v2 = vld [vmem:[%s2840_s5 + $0x4] sm:$0xf]  ;;  %s2494_s5 = smov [#allocation15]  }
 0x1ad   :  { %v872_v3 = vrot.slane %v1713_v2, %v2763_v8  ;;  %s1486_s16 = sshll.u32 %s2494_s5, 4  ;;  %s1487_s16 = int_to_ptr.vmem [resolvable:$true] %s1486_s16 }
 0x1ae   :  { %1240 = vmatpush1.bf16.msra.mxu0 %v2028_v4  ;;  %v876_v4 = vrot.slane %v1713_v2, %v2769_v10  ;;  %s2382_s2 = scalar_lea.vmem %s1487_s16, 256  ;;  %p2387_p11 = scmp.lt.s32.totalorder %s1487_s16, %s1487_s16 }
 0x1af   :  { %1281 = vmatpush1.bf16.msra.mxu1 %v2031_v5  ;;  %1428 = vmatprep.subr.bf16.mxu0 %v2036_v49  ;;  %p2383_p10 = scmp.ne.s32.totalorder %s1487_s16, %s2382_s2  ;;  %p2388_p2 = scmp.lt.s32.totalorder %s2382_s2, %s2382_s2 }
 0x1b1   :  { %p2389_p0 = por %p2388_p2, %p2387_p11 }
 0x1b3   :  { %p2390_p3 = pnand %p2389_p0, %p2383_p10 }
 0x244   :  { %v721_v14 = vpop.f32.mrb[0].mxu0 }
 0x245   :  { %v722_v15 = vadd.f32 %v721_v14, %v350_v11  ;;  %v723_v16 = vpop.f32.mrb[1].mxu0  ;;  %v762_v24 = vpop.f32.mrb[0].mxu1 }
 0x246   :  { %v724_v17 = vadd.f32 %v723_v16, %v354_v12  ;;  %v725_v18 = vpop.f32.mrb[2].mxu0  ;;  %v764_v25 = vpop.f32.mrb[1].mxu1  ;;  %v763_v31 = vadd.f32 %v762_v24, %v358_v28  ;;  %v880_v24 = vrot.slane %v1713_v2, %v357_v23 }
 0x247   :  { %v1710_v19 = vmul.f32 -1.442695, %v722_v15  ;;  %v726_v20 = vpop.f32.mrb[3].mxu0  ;;  %v765_v26 = vadd.f32 %v764_v25, %v362_v21  ;;  %v766_v27 = vpop.f32.mrb[2].mxu1  ;;  %v884_v21 = vrot.slane %v1713_v2, %v361_v13 }
 0x248   :  { %v1711_v22 = vmul.f32 -1.442695, %v724_v17  ;;  %v767_v29 = vpop.f32.mrb[3].mxu1 }
 0x249   :  { %2058 = vpow2.f32 %v1710_v19  ;;  %v1712_v30 = vmul.f32 -1.442695, %v765_v26 }
 0x24a   :  { %2060 = vpow2.f32 %v1711_v22 }
 0x24b   :  { %2062 = vpow2.f32 %v1712_v30 }
 0x24c   :  { %2064 = vtanh.f32 %v763_v31 }
 0x253   :  { %v2059_v32 = vpop.eup %2058 }
 0x254   :  { %v2061_v33 = vpop.eup %2060  ;;  %v772_v34 = vadd.f32 1.0, %v2059_v32 }
 0x255   :  { %v778_v35 = vadd.f32 1.0, %v2061_v33  ;;  %v2063_v36 = vpop.eup %2062  ;;  %v798_v33 = vld [vmem:[#allocation9 + $0x8] sm:$0xff] }
 0x256   :  { %2066 = vrcp.f32 %v772_v34  ;;  %v2065_v37 = vpop.eup %2064  ;;  %v785_v40 = vadd.f32 1.0, %v2063_v36 }
 0x257   :  { %2068 = vrcp.f32 %v778_v35 }
 0x258   :  { %2070 = vrcp.f32 %v785_v40 }
 0x260   :  { %v2067_v39 = vpop.eup %2066 }
 0x261   :  { %v2069_v41 = vpop.eup %2068  ;;  %v789_v42 = vmul.f32 %v2067_v39, %v2065_v37 }
 0x262   :  { %v788_v43 = vmul.f32 %v2069_v41, %v278_v38  ;;  %v2071_v45 = vpop.eup %2070 }
 0x264   :  { %v790_v44 = vadd.f32 %v789_v42, %v788_v43 }
 0x266   :  { %2072 = vtanh.f32 %v790_v44  ;;  %794 = vst [vmem:[#allocation17] sm:$0xff] %v790_v44 }
 0x270   :  { %v2073_v46 = vpop.eup %2072 }
 0x271   :  { %v792_v47 = vmul.f32 %v2073_v46, %v2071_v45 }
 0x273   :  { %v799_v48 = vpack.c.bf16 %v792_v47, %v792_v47  ;;  %793 = vst [vmem:[#allocation15] sm:$0xff] %v792_v47 }
 0x275   :  { %1242 = vmatmul.mubr.bf16.vlgmr.msra.gmra.mrb[4].mxu0 %v799_v48  ;;  %1283 = vmatmul.mubr.bf16.vlgmr.msra.gmra.mrb[4].mxu1 %v799_v48 }
 0x276   :  { %1429 = vmatpush1.bf16.msra.mxu0 %v2034_v50  ;;  %1460 = vmatprep.mubr.bf16.mxu0 %v2493_v62 }
 0x277   :  { %1430 = vmatprep.subr.bf16.mxu0 %v2039_v51 }
 0x27a   :  { %1431 = vmatpush1.bf16.msra.mxu0 %v2037_v52 }
 0x27b   :  { %1432 = vmatprep.subr.bf16.mxu0 %v2042_v53 }
 0x27e   :  { %1433 = vmatpush1.bf16.msra.mxu0 %v2040_v54 }
 0x27f   :  { %1434 = vmatprep.subr.bf16.mxu0 %v2045_v55 }
 0x282   :  { %1435 = vmatpush1.bf16.msra.mxu0 %v2043_v56 }
 0x283   :  { %1436 = vmatprep.subr.bf16.mxu0 %v2048_v57 }
 0x286   :  { %1437 = vmatpush1.bf16.msra.mxu0 %v2046_v58 }
 0x287   :  { %1438 = vmatprep.subr.bf16.mxu0 %v2051_v59 }
 0x28a   :  { %1439 = vmatpush1.bf16.msra.mxu0 %v2049_v60 }
 0x28b   :  { %1440 = vmatprep.subr.bf16.mxu0 %v2054_v61 }
 0x28e   :  { %1441 = vmatpush1.bf16.msra.mxu0 %v2052_v63 }
 0x28f   :  { %1442 = vmatprep.subr.bf16.mxu0 %v2057_v0 }
 0x292   :  { %1443 = vmatpush1.bf16.msra.mxu0 %v2055_v1 }
 0x348   :  { %v1243_v5 = vpop.f32.mrb[4].mxu0  ;;  %v1284_v6 = vpop.f32.mrb[4].mxu1 }
 0x349   :  { %v1244_v9 = vadd.f32 %v1243_v5, %v872_v3  ;;  %v1245_v11 = vpop.f32.mrb[5].mxu0  ;;  %v1286_v12 = vpop.f32.mrb[5].mxu1  ;;  %v1285_v26 = vadd.f32 %v1284_v6, %v880_v24 }
 0x34a   :  { %v1246_v14 = vadd.f32 %v1245_v11, %v876_v4  ;;  %v1247_v15 = vpop.f32.mrb[6].mxu0  ;;  %v1288_v16 = vpop.f32.mrb[6].mxu1  ;;  %v1287_v22 = vadd.f32 %v1286_v12, %v884_v21 }
 0x34b   :  { %v1778_v17 = vmul.f32 -1.442695, %v1244_v9  ;;  %v1248_v18 = vpop.f32.mrb[7].mxu0  ;;  %v1289_v19 = vpop.f32.mrb[7].mxu1 }
 0x34c   :  { %v1779_v20 = vmul.f32 -1.442695, %v1246_v14  ;;  %v1780_v25 = vmul.f32 -1.442695, %v1287_v22 }
 0x34d   :  { %2074 = vpow2.f32 %v1778_v17 }
 0x34e   :  { %2076 = vpow2.f32 %v1779_v20 }
 0x34f   :  { %2078 = vpow2.f32 %v1780_v25 }
 0x350   :  { %2080 = vtanh.f32 %v1285_v26 }
 0x357   :  { %v2075_v27 = vpop.eup %2074 }
 0x358   :  { %v2077_v28 = vpop.eup %2076  ;;  %v1294_v29 = vadd.f32 1.0, %v2075_v27 }
 0x359   :  { %v1300_v30 = vadd.f32 1.0, %v2077_v28  ;;  %v2079_v31 = vpop.eup %2078 }
 0x35a   :  { %2082 = vrcp.f32 %v1294_v29  ;;  %v2081_v32 = vpop.eup %2080  ;;  %v1307_v36 = vadd.f32 1.0, %v2079_v31 }
 0x35b   :  { %2084 = vrcp.f32 %v1300_v30 }
 0x35c   :  { %2086 = vrcp.f32 %v1307_v36 }
 0x364   :  { %v2083_v13 = vpop.eup %2082 }
 0x365   :  { %v2085_v34 = vpop.eup %2084  ;;  %v1311_v35 = vmul.f32 %v2083_v13, %v2081_v32 }
 0x366   :  { %v1310_v37 = vmul.f32 %v2085_v34, %v798_v33  ;;  %v2087_v23 = vpop.eup %2086 }
 0x368   :  { %v1312_v7 = vadd.f32 %v1311_v35, %v1310_v37 }
 0x36a   :  { %2088 = vtanh.f32 %v1312_v7  ;;  %1318 = vst [vmem:[#allocation17 + $0x8] sm:$0xff] %v1312_v7 }
 0x374   :  { %v2089_v38 = vpop.eup %2088 }
 0x375   :  { %v1314_v39 = vmul.f32 %v2089_v38, %v2087_v23 }
 0x377   :  { %v1319_v40 = vpack.c.bf16 %v1314_v39, %v1314_v39  ;;  %1316 = vst [vmem:[#allocation15 + $0x8] sm:$0xff] %v1314_v39 }
 0x379   :  { %1461 = vmatmul.mubr.bf16.vlgmr.msra.gmra.mrb[8].mxu0 %v1319_v40 }
 0x37a   :  { %2393 = shalt.err (!%p2390_p3)
}
 0x37b   :  { %s2394_s11 = scalar_lea.hbm %s2844_s9, 256 }
 0x37c   :  { %p2395_p1 = scmp.ne.s32.totalorder %s2844_s9, %s2394_s11  ;;  %p2398_p13 = scmp.lt.u32.totalorder %s2394_s11, %s2844_s9 }
 0x37e   :  { %p2400_p4 = pnand %p2398_p13, %p2395_p1 }
 0x380   :  { %2403 = shalt.err (!%p2400_p4)
}
 0x381   :  { %1492 = dma.vmem_to_hbm [thread:$0]  %s1487_s16, 256, %s2844_s9, [#allocation16], %s2477_s0, %s2477_s0, %s2478_s26  }
 0x382   :  { %s2495_s20 = smov [#allocation17]  }
 0x383   :  { %s1498_s12 = sshll.u32 %s2495_s20, 4  ;;  %s1499_s12 = int_to_ptr.vmem [resolvable:$true] %s1498_s12 }
 0x384   :  { %s2404_s19 = scalar_lea.vmem %s1499_s12, 256  ;;  %p2409_p7 = scmp.lt.s32.totalorder %s1499_s12, %s1499_s12 }
 0x385   :  { %p2405_p6 = scmp.ne.s32.totalorder %s1499_s12, %s2404_s19  ;;  %p2410_p5 = scmp.lt.s32.totalorder %s2404_s19, %s2404_s19 }
 0x387   :  { %p2411_p12 = por %p2410_p5, %p2409_p7 }
 0x389   :  { %p2412_p8 = pnand %p2411_p12, %p2405_p6 }
 0x38b   :  { %2415 = shalt.err (!%p2412_p8)
}
 0x38c   :  { %s2416_s4 = scalar_lea.hbm %s2845_s10, 256 }
 0x38d   :  { %p2417_p9 = scmp.ne.s32.totalorder %s2845_s10, %s2416_s4  ;;  %p2420_p10 = scmp.lt.u32.totalorder %s2416_s4, %s2845_s10 }
 0x38f   :  { %p2422_p11 = pnand %p2420_p10, %p2417_p9 }
 0x391   :  { %2425 = shalt.err (!%p2422_p11)
}
 0x392   :  { %1504 = dma.vmem_to_hbm [thread:$0]  %s1499_s12, 256, %s2845_s10, [#allocation16], %s2477_s0, %s2477_s0, %s2478_s26  }
 0x393   :  { %v1336_v41 = vld [vmem:[%s2842_s7] sm:$0x3]  ;;  %s2496_s5 = smov [#allocation14]  }
 0x394   :  { %v1341_v42 = vrot.slane %v1336_v41, %v2763_v8  ;;  %v1345_v43 = vrot.slane %v1336_v41, %v2769_v10  ;;  %s1477_s16 = sshll.u32 %s2496_s5, 4  ;;  %s1478_s16 = int_to_ptr.vmem [resolvable:$true] %s1477_s16 }
 0x395   :  { %s2426_s10 = scalar_lea.vmem %s1478_s16, 256  ;;  %p2431_p0 = scmp.lt.s32.totalorder %s1478_s16, %s1478_s16 }
 0x396   :  { %p2427_p2 = scmp.ne.s32.totalorder %s1478_s16, %s2426_s10  ;;  %p2432_p3 = scmp.lt.s32.totalorder %s2426_s10, %s2426_s10 }
 0x398   :  { %p2433_p1 = por %p2432_p3, %p2431_p0 }
 0x39a   :  { %p2434_p13 = pnand %p2433_p1, %p2427_p2 }
 0x44c   :  { %v1462_v44 = vpop.f32.mrb[8].mxu0 }
 0x44d   :  { %v1463_v45 = vadd.f32 %v1462_v44, %v1341_v42  ;;  %v1464_v46 = vpop.f32.mrb[9].mxu0 }
 0x44e   :  { %v1465_v47 = vadd.f32 %v1464_v46, %v1345_v43  ;;  %v1466_v48 = vpop.f32.mrb[10].mxu0 }
 0x44f   :  { %1469 = vst [vmem:[#allocation14] sm:$0xff] %v1463_v45  ;;  %v1467_v49 = vpop.f32.mrb[11].mxu0 }
 0x450   :  { %1470 = vst [vmem:[#allocation14 + $0x8] sm:$0xff] %v1465_v47 }
 0x451   :  { %2437 = shalt.err (!%p2434_p13)
}
 0x452   :  { %s2438_s26 = scalar_lea.hbm %s2843_s8, 256 }
 0x453   :  { %p2439_p4 = scmp.ne.s32.totalorder %s2843_s8, %s2438_s26  ;;  %p2442_p6 = scmp.lt.u32.totalorder %s2438_s26, %s2843_s8 }
 0x455   :  { %p2444_p7 = pnand %p2442_p6, %p2439_p4 }
 0x457   :  { %2447 = shalt.err (!%p2444_p7)
}
 0x458   :  { %1480 = dma.vmem_to_hbm [thread:$0]  %s1478_s16, 256, %s2843_s8, [#allocation6]  }
 0x459   :  { %2472 = dma.done.wait [#allocation6], 256  }
 0x45a   :  { %2473 = vsyncadd [#allocation6], 4294967040 }
 0x45b   :  { %2474 = dma.done.wait [#allocation16], 512  }
 0x45c   :  { %2475 = vsyncadd [#allocation16], 4294966784 }
 0x45d   :  { %1514 = vsyncpa [#allocation5], 1 }
 0x45e   :  { %1515 = vsyncpa [#allocation10], 1 }
 0x45f   :  { %1516 = vsyncpa [#allocation13], 1 }
 0x460   :  { %1517 = vsyncpa [#allocation6], 1 }
 0x461   :  { %1518 = vsyncpa [#allocation16], 1 }
 0x462   :  { %1519 = vsyncpa [#allocation7], 1 }
 0x463   :  { %1520 = vsyncmov [#allocation3] }
 0x466   :  { %s1521_s3 = vpop.sfrf %1520 }
 0x467   :  { %p1797_p5 = scmp.ne.s32.totalorder %s1521_s3, 0 }
 0x469   :  { %1525 = shalt.err (%p1797_p5)  }
 0x46a   :  { %1527 = vsyncmov [#allocation3 + $0x1] }
 0x46d   :  { %s1528_s15 = vpop.sfrf %1527 }
 0x46e   :  { %p1798_p12 = scmp.ne.s32.totalorder %s1528_s15, 0 }
 0x470   :  { %1532 = shalt.err (%p1798_p12)  }
 0x471   :  { %1534 = vsyncmov [#allocation3 + $0x2] }
 0x474   :  { %s1535_s8 = vpop.sfrf %1534 }
 0x475   :  { %p1799_p8 = scmp.ne.s32.totalorder %s1535_s8, 0 }
 0x477   :  { %1539 = shalt.err (%p1799_p8)  }
 0x478   :  { %1541 = vsyncmov [#allocation3 + $0x3] }
 0x47b   :  { %s1542_s24 = vpop.sfrf %1541 }
 0x47c   :  { %p1800_p9 = scmp.ne.s32.totalorder %s1542_s24, 0 }
 0x47e   :  { %1546 = shalt.err (%p1800_p9)  }
 0x47f   :  { %1548 = vsyncmov [#allocation3 + $0x4] }
 0x482   :  { %s1549_s18 = vpop.sfrf %1548 }
 0x483   :  { %p1801_p10 = scmp.ne.s32.totalorder %s1549_s18, 0 }
 0x485   :  { %1553 = shalt.err (%p1801_p10)  }
 0x486   :  { %1555 = vsyncmov [#allocation3 + $0x5] }
 0x489   :  { %s1556_s20 = vpop.sfrf %1555 }
 0x48a   :  { %p1802_p11 = scmp.ne.s32.totalorder %s1556_s20, 0 }
 0x48c   :  { %1560 = shalt.err (%p1802_p11)  }
 0x48d   :  { %1562 = vsyncmov [#allocation3 + $0x6] }
 0x490   :  { %s1563_s12 = vpop.sfrf %1562 }
 0x491   :  { %p1803_p2 = scmp.ne.s32.totalorder %s1563_s12, 0 }
 0x493   :  { %1567 = shalt.err (%p1803_p2)  }
 0x494   :  { %1569 = vsyncmov [#allocation3 + $0x7] }
 0x497   :  { %s1570_s19 = vpop.sfrf %1569 }
 0x498   :  { %p1804_p0 = scmp.ne.s32.totalorder %s1570_s19, 0 }
 0x49a   :  { %1574 = shalt.err (%p1804_p0)  }

</bundles_post_ra>
